<compile_context>
chip_gen: v6e
topology: v6e:2x2x1
jax: 0.10.0
libtpu: 0.0.40
codegen_flags: <defaults>
</compile_context>

<pallas_src>
import functools

import jax
import jax.numpy as jnp
from jax.experimental import pallas as pl
from jax.experimental.pallas import tpu as pltpu


# ----------------------------------------------------------------------------
# Pallas kernels
# ----------------------------------------------------------------------------
def _conv1_kernel(p_ref, w_ref, b_ref, o_ref):
    """o = relu(p @ w + b) for one row tile of the conv1 im2col GEMM.

    p_ref: (tm, 300) bf16, w_ref: (300, 32) bf16, b_ref: (1, 32) f32,
    o_ref: (tm, 32) bf16.  f32 MXU accumulation, bias/ReLU in f32.
    """
    y = jnp.dot(p_ref[...], w_ref[...], preferred_element_type=jnp.float32)
    y = jnp.maximum(y + b_ref[...], 0.0)
    o_ref[...] = y.astype(o_ref.dtype)


def _tail_kernel(p2_ref, w2_ref, b2_ref, fc1w_ref, fc1b_ref,
                 fc2w_ref, fc2b_ref, fc3w_ref, fc3b_ref, o_ref, acc_ref):
    """Fused conv2 (im2col matmul) + ReLU + Flatten + fc1 + fc2 + fc3.

    p2_ref : (n_patch*tb, 2048) bf16  conv2 patches, patch-major inside the
                                      batch block (rows = p*tb + sample).
    w2_ref : (2048, 128) bf16         conv2 weights, channels padded 64->128.
    fc1w_ref: (n_patch, 128, 256) bf16 fc1 rows split per patch so the PyTorch
                                      (C,H,W) flatten is a sum of per-patch
                                      matmuls (no in-kernel reshape).
    acc_ref: (tb, 256) f32 VMEM scratch accumulator.
    """
    n_patch = fc1w_ref.shape[0]
    tb = o_ref.shape[0]

    # conv2 as ONE MXU push over all patches of this batch tile.
    h2 = jnp.dot(p2_ref[...], w2_ref[...], preferred_element_type=jnp.float32)
    h2 = jnp.maximum(h2 + b2_ref[...], 0.0)            # (4*tb, 128) f32, lane-dense
    h2 = h2.astype(fc1w_ref.dtype)                     # bf16 for the fc1 MXU pass

    # fc1: PyTorch (C,H,W) flatten == sum over patches of per-patch row blocks.
    acc_ref[...] = jnp.zeros_like(acc_ref)
    for p in range(n_patch):                           # static loop, n_patch == 4
        acc_ref[...] += jnp.dot(h2[p * tb:(p + 1) * tb], fc1w_ref[p],
                                preferred_element_type=jnp.float32)

    h = jnp.maximum(acc_ref[...] + fc1b_ref[...], 0.0).astype(fc2w_ref.dtype)
    h = jnp.dot(h, fc2w_ref[...], preferred_element_type=jnp.float32) + fc2b_ref[...]
    h = jnp.maximum(h, 0.0).astype(fc3w_ref.dtype)
    q = jnp.dot(h, fc3w_ref[...], preferred_element_type=jnp.float32) + fc3b_ref[...]
    o_ref[...] = q.astype(o_ref.dtype)                 # (tb, 128) lane-dense


# ----------------------------------------------------------------------------
# Tiling helpers
# ----------------------------------------------------------------------------
def _round_up(x, m):
    return (x + m - 1) // m * m


def _conv1_row_tiles(rows):
    """Row tiling for the conv1 GEMM: tiles of <= ~1024 rows (v5e scoped-VMEM
    safe), always >= 2 grid steps so both v7x TensorCores get work."""
    n_steps = max(2, pl.cdiv(rows, 1024))
    tile = _round_up(pl.cdiv(rows, n_steps), 16)       # multiple of 16 (bf16 tiles)
    return tile, n_steps


def _tail_tile(B):
    """Batch tile for the fused tail: multiple of 16, capped at 128; prefer
    >= 2 grid steps while keeping batch-padding waste <= ~25%."""
    best = 16
    for t in (32, 64, 128):
        if B > t and (pl.cdiv(B, t) * t - B) * 4 <= B:
            best = t
    return best


# ----------------------------------------------------------------------------
# Wrapper
# ----------------------------------------------------------------------------
def dqn_efficientnet_forward(x, params, num_actions):
    """x: (B, 3, H, W) NCHW float32 -> (B, num_actions) float32."""
    B = x.shape[0]
    f32, bf16 = jnp.float32, jnp.bfloat16

    # ---- conv1 window extraction: ONE XLA op, in bf16 (halves the dominant
    #      HBM stream).  Feature order is (Cin, kh, kw) = PyTorch flatten.
    p1 = jax.lax.conv_general_dilated_patches(
        x.astype(bf16), filter_shape=(10, 10), window_strides=(5, 5),
        padding="VALID", dimension_numbers=("NCHW", "OIHW", "NHWC"))
    _, Ho1, Wo1, K1 = p1.shape                         # (B, 12, 12, 300)
    rows = B * Ho1 * Wo1
    p1 = p1.reshape(rows, K1)

    tm, n1 = _conv1_row_tiles(rows)
    rows_pad = tm * n1
    if rows_pad != rows:
        p1 = jnp.pad(p1, ((0, rows_pad - rows), (0, 0)))

    w1, b1 = params["conv1_w_mat"], params["conv1_b"]
    co1 = w1.shape[1]

    h1 = pl.pallas_call(
        _conv1_kernel,
        out_shape=jax.ShapeDtypeStruct((rows_pad, co1), bf16),
        grid=(n1,),
        in_specs=[
            pl.BlockSpec((tm, K1), lambda i: (i, 0)),
            pl.BlockSpec((K1, co1), lambda i: (0, 0)),
            pl.BlockSpec((1, co1), lambda i: (0, 0)),
        ],
        out_specs=pl.BlockSpec((tm, co1), lambda i: (i, 0)),
        compiler_params=pltpu.CompilerParams(
            dimension_semantics=("parallel",),
            vmem_limit_bytes=32 * 1024 * 1024),
        cost_estimate=pl.CostEstimate(
            flops=2 * rows_pad * K1 * co1, transcendentals=0,
            bytes_accessed=2 * rows_pad * K1 + 2 * K1 * co1
                           + 4 * co1 + 2 * rows_pad * co1),
    )(p1, w1, b1)

    h1 = h1[:rows].reshape(B, Ho1, Wo1, co1)           # NHWC bf16, no NCHW transpose

    # ---- conv2 window extraction: ONE XLA op, bf16, feature order (Cin,kh,kw).
    p2 = jax.lax.conv_general_dilated_patches(
        h1, filter_shape=(8, 8), window_strides=(4, 4), padding="VALID",
        dimension_numbers=("NHWC", "HWIO", "NHWC"))
    _, Ho2, Wo2, K2 = p2.shape                         # (B, 2, 2, 2048)
    n_patch = Ho2 * Wo2

    tb = _tail_tile(B)
    n2 = pl.cdiv(B, tb)
    B_pad = n2 * tb
    p2 = p2.reshape(B, n_patch, K2)
    if B_pad != B:
        p2 = jnp.pad(p2, ((0, B_pad - B), (0, 0), (0, 0)))
    # Batch-block-major / patch-major layout: each grid step reads one plain
    # (n_patch*tb, K2) 2-D tile (rows = p*tb + sample) -> single MXU push,
    # no in-kernel reshapes.  Layout plumbing stays in the wrapper.
    p2 = (p2.reshape(n2, tb, n_patch, K2)
             .transpose(0, 2, 1, 3)
             .reshape(n2 * n_patch * tb, K2))

    w2, b2 = params["conv2_w_mat"], params["conv2_b"]
    fc1w, fc1b = params["fc1_w_blk"], params["fc1_b"]
    fc2w, fc2b = params["fc2_w"], params["fc2_b"]
    fc3w, fc3b = params["fc3_w_pad"], params["fc3_b_pad"]
    co2p, d1, d2, d3 = w2.shape[1], fc1w.shape[2], fc2w.shape[1], fc3w.shape[1]
    assert n_patch == fc1w.shape[0]

    flops2 = 2 * B_pad * (n_patch * K2 * co2p + n_patch * co2p * d1
                          + d1 * d2 + d2 * d3)
    bytes2 = (2 * n_patch * B_pad * K2
              + 2 * (K2 * co2p + n_patch * co2p * d1 + d1 * d2 + d2 * d3)
              + 4 * (co2p + d1 + d2 + d3) + 4 * B_pad * d3)

    q_pad = pl.pallas_call(
        _tail_kernel,
        out_shape=jax.ShapeDtypeStruct((B_pad, d3), f32),
        grid=(n2,),
        in_specs=[
            pl.BlockSpec((n_patch * tb, K2), lambda i: (i, 0)),
            pl.BlockSpec((K2, co2p), lambda i: (0, 0)),
            pl.BlockSpec((1, co2p), lambda i: (0, 0)),
            pl.BlockSpec((n_patch, co2p, d1), lambda i: (0, 0, 0)),
            pl.BlockSpec((1, d1), lambda i: (0, 0)),
            pl.BlockSpec((d1, d2), lambda i: (0, 0)),
            pl.BlockSpec((1, d2), lambda i: (0, 0)),
            pl.BlockSpec((d2, d3), lambda i: (0, 0)),
            pl.BlockSpec((1, d3), lambda i: (0, 0)),
        ],
        out_specs=pl.BlockSpec((tb, d3), lambda i: (i, 0)),
        scratch_shapes=[pltpu.VMEM((tb, d1), jnp.float32)],
        compiler_params=pltpu.CompilerParams(
            dimension_semantics=("parallel",),
            vmem_limit_bytes=32 * 1024 * 1024),
        cost_estimate=pl.CostEstimate(flops=flops2, transcendentals=0,
                                      bytes_accessed=bytes2),
    )(p2, w2, b2, fc1w, fc1b, fc2w, fc2b, fc3w, fc3b)

    return q_pad[:B, :num_actions]


# ----------------------------------------------------------------------------
# Parameters (raw = PyTorch layout; prepare = one-time offline repacking)
# ----------------------------------------------------------------------------
def init_params(key, num_actions):
    ks = jax.random.split(key, 10)
    scale = 0.05

    def w(k, shape):
        return (scale * jax.random.normal(k, shape)).astype(jnp.float32)

    return {
        "conv1_w": w(ks[0], (32, 3, 10, 10)),   # Conv2d(3, 32, k=10, s=5)
        "conv1_b": w(ks[1], (32,)),
        "conv2_w": w(ks[2], (64, 32, 8, 8)),    # Conv2d(32, 64, k=8, s=4)
        "conv2_b": w(ks[3], (64,)),
        "fc1_w": w(ks[4], (256, 256)),          # Linear(256, 256), stored (in, out)
        "fc1_b": w(ks[5], (256,)),
        "fc2_w": w(ks[6], (256, 128)),          # Linear(256, 128)
        "fc2_b": w(ks[7], (128,)),
        "fc3_w": w(ks[8], (128, num_actions)),  # Linear(128, A)
        "fc3_b": w(ks[9], (num_actions,)),
    }


def prepare_params(raw, num_actions):
    """Offline repack: im2col weight matrices, bf16 weights, lane padding."""
    assert num_actions <= 128
    bf16, f32 = jnp.bfloat16, jnp.float32
    c1, c2 = raw["conv1_w"], raw["conv2_w"]
    co1, co2 = c1.shape[0], c2.shape[0]
    co2_pad = 128                     # lane-dense conv2 channels (64 -> 128)
    n_patch = 4                       # conv2 output spatial = 2x2 (Linear(256,.) fixes it)
    d1 = raw["fc1_w"].shape[1]

    w2 = c2.reshape(co2, -1).T                                   # (2048, 64), rows (Cin,kh,kw)
    w2_pad = jnp.zeros((w2.shape[0], co2_pad), f32).at[:, :co2].set(w2)
    b2_pad = jnp.zeros((1, co2_pad), f32).at[:, :co2].set(raw["conv2_b"][None, :])

    # fc1 rows are indexed by PyTorch flatten (c, h, w) of the (64, 2, 2) conv2
    # output; split into per-(h,w) blocks of channel-rows, zero-pad rows to 128.
    fc1_blk = raw["fc1_w"].reshape(co2, n_patch, d1).transpose(1, 0, 2)   # (4, 64, 256)
    fc1_blk_pad = jnp.zeros((n_patch, co2_pad, d1), f32).at[:, :co2, :].set(fc1_blk)

    npad = 128                        # lane-dense fc3 output
    fc3_w_pad = jnp.zeros((raw["fc3_w"].shape[0], npad), f32).at[:, :num_actions].set(raw["fc3_w"])
    fc3_b_pad = jnp.zeros((1, npad), f32).at[:, :num_actions].set(raw["fc3_b"][None, :])

    return {
        "conv1_w_mat": c1.reshape(co1, -1).T.astype(bf16),   # (300, 32), rows (Cin,kh,kw)
        "conv1_b": raw["conv1_b"].reshape(1, co1),           # f32
        "conv2_w_mat": w2_pad.astype(bf16),                  # (2048, 128)
        "conv2_b": b2_pad,                                   # (1, 128) f32
        "fc1_w_blk": fc1_blk_pad.astype(bf16),               # (4, 128, 256)
        "fc1_b": raw["fc1_b"].reshape(1, -1),                # f32
        "fc2_w": raw["fc2_w"].astype(bf16),                  # (256, 128)
        "fc2_b": raw["fc2_b"].reshape(1, -1),
        "fc3_w_pad": fc3_w_pad.astype(bf16),                 # (128, 128)
        "fc3_b_pad": fc3_b_pad,                              # (1, 128)
    }


# ----------------------------------------------------------------------------
# References (PyTorch semantics) for correctness checks.
# ----------------------------------------------------------------------------
def reference_forward(x, raw):
    """Pure f32 reference (Precision.HIGHEST)."""
    hi = jax.lax.Precision.HIGHEST
    dn = ("NCHW", "OIHW", "NCHW")
    h = jax.lax.conv_general_dilated(x, raw["conv1_w"], (5, 5), "VALID",
                                     dimension_numbers=dn, precision=hi)
    h = jnp.maximum(h + raw["conv1_b"][None, :, None, None], 0.0)
    h = jax.lax.conv_general_dilated(h, raw["conv2_w"], (4, 4), "VALID",
                                     dimension_numbers=dn, precision=hi)
    h = jnp.maximum(h + raw["conv2_b"][None, :, None, None], 0.0)
    h = h.reshape(h.shape[0], -1)                           # PyTorch NCHW flatten
    h = jnp.maximum(jnp.dot(h, raw["fc1_w"], precision=hi) + raw["fc1_b"], 0.0)
    h = jnp.maximum(jnp.dot(h, raw["fc2_w"], precision=hi) + raw["fc2_b"], 0.0)
    return jnp.dot(h, raw["fc3_w"], precision=hi) + raw["fc3_b"]


def reference_forward_bf16(x, raw):
    """Reference with the SAME bf16-input / f32-accumulate choices as the
    kernels (tight check of layout + kernel logic)."""
    bf16, f32 = jnp.bfloat16, jnp.float32
    dn = ("NCHW", "OIHW", "NCHW")
    h = jax.lax.conv_general_dilated(
        x.astype(bf16), raw["conv1_w"].astype(bf16), (5, 5), "VALID",
        dimension_numbers=dn, preferred_element_type=f32)
    h = jnp.maximum(h + raw["conv1_b"][None, :, None, None], 0.0).astype(bf16)
    h = jax.lax.conv_general_dilated(
        h, raw["conv2_w"].astype(bf16), (4, 4), "VALID",
        dimension_numbers=dn, preferred_element_type=f32)
    h = jnp.maximum(h + raw["conv2_b"][None, :, None, None], 0.0)
    h = h.reshape(h.shape[0], -1).astype(bf16)              # PyTorch NCHW flatten
    h = jnp.dot(h, raw["fc1_w"].astype(bf16), preferred_element_type=f32) + raw["fc1_b"]
    h = jnp.maximum(h, 0.0).astype(bf16)
    h = jnp.dot(h, raw["fc2_w"].astype(bf16), preferred_element_type=f32) + raw["fc2_b"]
    h = jnp.maximum(h, 0.0).astype(bf16)
    return jnp.dot(h, raw["fc3_w"].astype(bf16), preferred_element_type=f32) + raw["fc3_b"]


def _rel_err(a, b):
    return float(jnp.max(jnp.abs(a - b)) / (jnp.max(jnp.abs(b)) + 1e-8))


if __name__ == "__main__":
    num_actions = 6

    key = jax.random.PRNGKey(0)
    k_x, k_p = jax.random.split(key)
    raw = init_params(k_p, num_actions)
    kparams = prepare_params(raw, num_actions)

    fwd = jax.jit(functools.partial(dqn_efficientnet_forward,
                                    num_actions=num_actions))
    ref_bf = jax.jit(reference_forward_bf16)
    ref_f32 = jax.jit(reference_forward)

    # 65x65 input: conv1 (65-10)/5+1 = 12 -> conv2 (12-8)/4+1 = 2 -> 64*2*2 = 256
    for batch in (2, 34):   # 34 exercises row/batch padding + multi-step tail grid
        xk = jax.random.fold_in(k_x, batch)
        x = jax.random.normal(xk, (batch, 3, 65, 65), dtype=jnp.float32)

        q = fwd(x, kparams)
        jax.block_until_ready(q)
        assert q.shape == (batch, num_actions), q.shape
        assert q.dtype == jnp.float32

        q_bf = ref_bf(x, raw)
        q_f32 = ref_f32(x, raw)
        jax.block_until_ready((q_bf, q_f32))

        err_bf = _rel_err(q, q_bf)     # same precision choices -> should be tiny
        err_f32 = _rel_err(q, q_f32)   # bf16-vs-f32 numerics -> loose bound
        assert err_bf < 2e-2, f"B={batch}: mismatch vs bf16-matched ref: {err_bf}"
        assert err_f32 < 1.5e-1, f"B={batch}: mismatch vs f32 ref: {err_f32}"

    print("KERNEL_OK")
</pallas_src>

<mosaic_0001>
module attributes {stable_mosaic.version = 11 : i64} {
  func.func @_conv1_kernel(%arg0: i32, %arg1: memref<144x300xbf16, #tpu.memory_space<vmem>>, %arg2: memref<300x32xbf16, #tpu.memory_space<vmem>>, %arg3: memref<1x32xf32, #tpu.memory_space<vmem>>, %arg4: memref<144x32xbf16, #tpu.memory_space<vmem>>) attributes {dimension_semantics = [#tpu.dimension_semantics<parallel>], iteration_bounds = array<i64: 2>, scalar_prefetch = 0 : i64, scratch_operands = 0 : i64, tpu.core_type = #tpu.core_type<tc>, window_params = [{transform_indices = @transform_0, window_bounds = array<i64: 144, 300>}, {pipeline_mode = #tpu.pipeline_mode<synchronous>, transform_indices = @transform_1, window_bounds = array<i64: 300, 32>}, {pipeline_mode = #tpu.pipeline_mode<synchronous>, transform_indices = @transform_2, window_bounds = array<i64: 1, 32>}, {transform_indices = @transform_3, window_bounds = array<i64: 144, 32>}]} {
    %c0 = arith.constant 0 : index
    %c0_0 = arith.constant 0 : index
    %0 = vector.load %arg1[%c0, %c0_0] : memref<144x300xbf16, #tpu.memory_space<vmem>>, vector<144x300xbf16>
    %c0_1 = arith.constant 0 : index
    %c0_2 = arith.constant 0 : index
    %1 = vector.load %arg2[%c0_1, %c0_2] : memref<300x32xbf16, #tpu.memory_space<vmem>>, vector<300x32xbf16>
    %cst = arith.constant dense<0.000000e+00> : vector<144x32xf32>
    %2 = tpu.matmul %0, %1, %cst {dimension_numbers = #tpu.dot_dimension_numbers<[1], [0], [0], [1], [0, 0, 1, 1], [], []>} : vector<144x300xbf16>, vector<300x32xbf16>, vector<144x32xf32> -> vector<144x32xf32>
    %c0_3 = arith.constant 0 : index
    %c0_4 = arith.constant 0 : index
    %3 = vector.load %arg3[%c0_3, %c0_4] : memref<1x32xf32, #tpu.memory_space<vmem>>, vector<1x32xf32>
    %4 = vector.broadcast %3 : vector<1x32xf32> to vector<144x32xf32>
    %5 = arith.addf %2, %4 : vector<144x32xf32>
    %cst_5 = arith.constant 0.000000e+00 : f32
    %6 = vector.broadcast %cst_5 : f32 to vector<144x32xf32>
    %7 = arith.maximumf %5, %6 : vector<144x32xf32>
    %8 = arith.truncf %7 : vector<144x32xf32> to vector<144x32xbf16>
    %c0_6 = arith.constant 0 : index
    %c0_7 = arith.constant 0 : index
    %9 = vector.load %arg4[%c0_6, %c0_7] : memref<144x32xbf16, #tpu.memory_space<vmem>>, vector<144x32xbf16>
    tpu.vector_store %arg4[%c0_6, %c0_7], %8 {strides = array<i32>} : memref<144x32xbf16, #tpu.memory_space<vmem>>, vector<144x32xbf16>,
    return
  }
  func.func @transform_0(%arg0: i32) -> (i32, i32) {
    %c0_i32 = arith.constant 0 : i32
    %c0_i32_0 = arith.constant 0 : i32
    return %arg0, %c0_i32 : i32, i32
  }
  func.func @transform_1(%arg0: i32) -> (i32, i32) {
    %c0_i32 = arith.constant 0 : i32
    %c0_i32_0 = arith.constant 0 : i32
    %c0_i32_1 = arith.constant 0 : i32
    return %c0_i32, %c0_i32_0 : i32, i32
  }
  func.func @transform_2(%arg0: i32) -> (i32, i32) {
    %c0_i32 = arith.constant 0 : i32
    %c0_i32_0 = arith.constant 0 : i32
    %c0_i32_1 = arith.constant 0 : i32
    return %c0_i32, %c0_i32_0 : i32, i32
  }
  func.func @transform_3(%arg0: i32) -> (i32, i32) {
    %c0_i32 = arith.constant 0 : i32
    %c0_i32_0 = arith.constant 0 : i32
    return %arg0, %c0_i32 : i32, i32
  }
}

module attributes {stable_mosaic.version = 11 : i64} {
  func.func @_tail_kernel(%arg0: i32, %arg1: memref<64x2048xbf16, #tpu.memory_space<vmem>>, %arg2: memref<2048x128xbf16, #tpu.memory_space<vmem>>, %arg3: memref<1x128xf32, #tpu.memory_space<vmem>>, %arg4: memref<4x128x256xbf16, #tpu.memory_space<vmem>>, %arg5: memref<1x256xf32, #tpu.memory_space<vmem>>, %arg6: memref<256x128xbf16, #tpu.memory_space<vmem>>, %arg7: memref<1x128xf32, #tpu.memory_space<vmem>>, %arg8: memref<128x128xbf16, #tpu.memory_space<vmem>>, %arg9: memref<1x128xf32, #tpu.memory_space<vmem>>, %arg10: memref<16x128xf32, #tpu.memory_space<vmem>>, %arg11: memref<16x256xf32, #tpu.memory_space<vmem>>) attributes {dimension_semantics = [#tpu.dimension_semantics<parallel>], iteration_bounds = array<i64: 1>, scalar_prefetch = 0 : i64, scratch_operands = 1 : i64, tpu.core_type = #tpu.core_type<tc>, window_params = [{transform_indices = @transform_0, window_bounds = array<i64: 64, 2048>}, {pipeline_mode = #tpu.pipeline_mode<synchronous>, transform_indices = @transform_1, window_bounds = array<i64: 2048, 128>}, {pipeline_mode = #tpu.pipeline_mode<synchronous>, transform_indices = @transform_2, window_bounds = array<i64: 1, 128>}, {pipeline_mode = #tpu.pipeline_mode<synchronous>, transform_indices = @transform_3, window_bounds = array<i64: 4, 128, 256>}, {pipeline_mode = #tpu.pipeline_mode<synchronous>, transform_indices = @transform_4, window_bounds = array<i64: 1, 256>}, {pipeline_mode = #tpu.pipeline_mode<synchronous>, transform_indices = @transform_5, window_bounds = array<i64: 256, 128>}, {pipeline_mode = #tpu.pipeline_mode<synchronous>, transform_indices = @transform_6, window_bounds = array<i64: 1, 128>}, {pipeline_mode = #tpu.pipeline_mode<synchronous>, transform_indices = @transform_7, window_bounds = array<i64: 128, 128>}, {pipeline_mode = #tpu.pipeline_mode<synchronous>, transform_indices = @transform_8, window_bounds = array<i64: 1, 128>}, {transform_indices = @transform_9, window_bounds = array<i64: 16, 128>}]} {
    %c0 = arith.constant 0 : index
    %c0_0 = arith.constant 0 : index
    %0 = vector.load %arg1[%c0, %c0_0] : memref<64x2048xbf16, #tpu.memory_space<vmem>>, vector<64x2048xbf16>
    %c0_1 = arith.constant 0 : index
    %c0_2 = arith.constant 0 : index
    %1 = vector.load %arg2[%c0_1, %c0_2] : memref<2048x128xbf16, #tpu.memory_space<vmem>>, vector<2048x128xbf16>
    %cst = arith.constant dense<0.000000e+00> : vector<64x128xf32>
    %2 = tpu.matmul %0, %1, %cst {dimension_numbers = #tpu.dot_dimension_numbers<[1], [0], [0], [1], [0, 0, 1, 1], [], []>} : vector<64x2048xbf16>, vector<2048x128xbf16>, vector<64x128xf32> -> vector<64x128xf32>
    %c0_3 = arith.constant 0 : index
    %c0_4 = arith.constant 0 : index
    %3 = vector.load %arg3[%c0_3, %c0_4] : memref<1x128xf32, #tpu.memory_space<vmem>>, vector<1x128xf32>
    %4 = vector.broadcast %3 : vector<1x128xf32> to vector<64x128xf32>
    %5 = arith.addf %2, %4 : vector<64x128xf32>
    %cst_5 = arith.constant 0.000000e+00 : f32
    %6 = vector.broadcast %cst_5 : f32 to vector<64x128xf32>
    %7 = arith.maximumf %5, %6 : vector<64x128xf32>
    %8 = arith.truncf %7 : vector<64x128xf32> to vector<64x128xbf16>
    %cst_6 = arith.constant 0.000000e+00 : f32
    %9 = vector.broadcast %cst_6 : f32 to vector<16x256xf32>
    %c0_7 = arith.constant 0 : index
    %c0_8 = arith.constant 0 : index
    %10 = vector.load %arg11[%c0_7, %c0_8] : memref<16x256xf32, #tpu.memory_space<vmem>>, vector<16x256xf32>
    tpu.vector_store %arg11[%c0_7, %c0_8], %9 {strides = array<i32>} : memref<16x256xf32, #tpu.memory_space<vmem>>, vector<16x256xf32>,
    %c0_9 = arith.constant 0 : index
    %c0_10 = arith.constant 0 : index
    %11 = vector.load %arg11[%c0_9, %c0_10] : memref<16x256xf32, #tpu.memory_space<vmem>>, vector<16x256xf32>
    %12 = vector.extract_strided_slice %8 {offsets = [0, 0], sizes = [16, 128], strides = [1, 1]} : vector<64x128xbf16> to vector<16x128xbf16>
    %c0_11 = arith.constant 0 : index
    %c0_12 = arith.constant 0 : index
    %c0_13 = arith.constant 0 : index
    %13 = vector.load %arg4[%c0_11, %c0_12, %c0_13] : memref<4x128x256xbf16, #tpu.memory_space<vmem>>, vector<1x128x256xbf16>
    %14 = vector.shape_cast %13 : vector<1x128x256xbf16> to vector<128x256xbf16>
    %cst_14 = arith.constant dense<0.000000e+00> : vector<16x256xf32>
    %15 = tpu.matmul %12, %14, %cst_14 {dimension_numbers = #tpu.dot_dimension_numbers<[1], [0], [0], [1], [0, 0, 1, 1], [], []>} : vector<16x128xbf16>, vector<128x256xbf16>, vector<16x256xf32> -> vector<16x256xf32>
    %16 = arith.addf %11, %15 : vector<16x256xf32>
    %c0_15 = arith.constant 0 : index
    %c0_16 = arith.constant 0 : index
    %17 = vector.load %arg11[%c0_15, %c0_16] : memref<16x256xf32, #tpu.memory_space<vmem>>, vector<16x256xf32>
    tpu.vector_store %arg11[%c0_15, %c0_16], %16 {strides = array<i32>} : memref<16x256xf32, #tpu.memory_space<vmem>>, vector<16x256xf32>,
    %c0_17 = arith.constant 0 : index
    %c0_18 = arith.constant 0 : index
    %18 = vector.load %arg11[%c0_17, %c0_18] : memref<16x256xf32, #tpu.memory_space<vmem>>, vector<16x256xf32>
    %19 = vector.extract_strided_slice %8 {offsets = [16, 0], sizes = [16, 128], strides = [1, 1]} : vector<64x128xbf16> to vector<16x128xbf16>
    %c1 = arith.constant 1 : index
    %c0_19 = arith.constant 0 : index
    %c0_20 = arith.constant 0 : index
    %20 = vector.load %arg4[%c1, %c0_19, %c0_20] : memref<4x128x256xbf16, #tpu.memory_space<vmem>>, vector<1x128x256xbf16>
    %21 = vector.shape_cast %20 : vector<1x128x256xbf16> to vector<128x256xbf16>
    %cst_21 = arith.constant dense<0.000000e+00> : vector<16x256xf32>
    %22 = tpu.matmul %19, %21, %cst_21 {dimension_numbers = #tpu.dot_dimension_numbers<[1], [0], [0], [1], [0, 0, 1, 1], [], []>} : vector<16x128xbf16>, vector<128x256xbf16>, vector<16x256xf32> -> vector<16x256xf32>
    %23 = arith.addf %18, %22 : vector<16x256xf32>
    %c0_22 = arith.constant 0 : index
    %c0_23 = arith.constant 0 : index
    %24 = vector.load %arg11[%c0_22, %c0_23] : memref<16x256xf32, #tpu.memory_space<vmem>>, vector<16x256xf32>
    tpu.vector_store %arg11[%c0_22, %c0_23], %23 {strides = array<i32>} : memref<16x256xf32, #tpu.memory_space<vmem>>, vector<16x256xf32>,
    %c0_24 = arith.constant 0 : index
    %c0_25 = arith.constant 0 : index
    %25 = vector.load %arg11[%c0_24, %c0_25] : memref<16x256xf32, #tpu.memory_space<vmem>>, vector<16x256xf32>
    %26 = vector.extract_strided_slice %8 {offsets = [32, 0], sizes = [16, 128], strides = [1, 1]} : vector<64x128xbf16> to vector<16x128xbf16>
    %c2 = arith.constant 2 : index
    %c0_26 = arith.constant 0 : index
    %c0_27 = arith.constant 0 : index
    %27 = vector.load %arg4[%c2, %c0_26, %c0_27] : memref<4x128x256xbf16, #tpu.memory_space<vmem>>, vector<1x128x256xbf16>
    %28 = vector.shape_cast %27 : vector<1x128x256xbf16> to vector<128x256xbf16>
    %cst_28 = arith.constant dense<0.000000e+00> : vector<16x256xf32>
    %29 = tpu.matmul %26, %28, %cst_28 {dimension_numbers = #tpu.dot_dimension_numbers<[1], [0], [0], [1], [0, 0, 1, 1], [], []>} : vector<16x128xbf16>, vector<128x256xbf16>, vector<16x256xf32> -> vector<16x256xf32>
    %30 = arith.addf %25, %29 : vector<16x256xf32>
    %c0_29 = arith.constant 0 : index
    %c0_30 = arith.constant 0 : index
    %31 = vector.load %arg11[%c0_29, %c0_30] : memref<16x256xf32, #tpu.memory_space<vmem>>, vector<16x256xf32>
    tpu.vector_store %arg11[%c0_29, %c0_30], %30 {strides = array<i32>} : memref<16x256xf32, #tpu.memory_space<vmem>>, vector<16x256xf32>,
    %c0_31 = arith.constant 0 : index
    %c0_32 = arith.constant 0 : index
    %32 = vector.load %arg11[%c0_31, %c0_32] : memref<16x256xf32, #tpu.memory_space<vmem>>, vector<16x256xf32>
    %33 = vector.extract_strided_slice %8 {offsets = [48, 0], sizes = [16, 128], strides = [1, 1]} : vector<64x128xbf16> to vector<16x128xbf16>
    %c3 = arith.constant 3 : index
    %c0_33 = arith.constant 0 : index
    %c0_34 = arith.constant 0 : index
    %34 = vector.load %arg4[%c3, %c0_33, %c0_34] : memref<4x128x256xbf16, #tpu.memory_space<vmem>>, vector<1x128x256xbf16>
    %35 = vector.shape_cast %34 : vector<1x128x256xbf16> to vector<128x256xbf16>
    %cst_35 = arith.constant dense<0.000000e+00> : vector<16x256xf32>
    %36 = tpu.matmul %33, %35, %cst_35 {dimension_numbers = #tpu.dot_dimension_numbers<[1], [0], [0], [1], [0, 0, 1, 1], [], []>} : vector<16x128xbf16>, vector<128x256xbf16>, vector<16x256xf32> -> vector<16x256xf32>
    %37 = arith.addf %32, %36 : vector<16x256xf32>
    %c0_36 = arith.constant 0 : index
    %c0_37 = arith.constant 0 : index
    %38 = vector.load %arg11[%c0_36, %c0_37] : memref<16x256xf32, #tpu.memory_space<vmem>>, vector<16x256xf32>
    tpu.vector_store %arg11[%c0_36, %c0_37], %37 {strides = array<i32>} : memref<16x256xf32, #tpu.memory_space<vmem>>, vector<16x256xf32>,
    %c0_38 = arith.constant 0 : index
    %c0_39 = arith.constant 0 : index
    %39 = vector.load %arg11[%c0_38, %c0_39] : memref<16x256xf32, #tpu.memory_space<vmem>>, vector<16x256xf32>
    %c0_40 = arith.constant 0 : index
    %c0_41 = arith.constant 0 : index
    %40 = vector.load %arg5[%c0_40, %c0_41] : memref<1x256xf32, #tpu.memory_space<vmem>>, vector<1x256xf32>
    %41 = vector.broadcast %40 : vector<1x256xf32> to vector<16x256xf32>
    %42 = arith.addf %39, %41 : vector<16x256xf32>
    %cst_42 = arith.constant 0.000000e+00 : f32
    %43 = vector.broadcast %cst_42 : f32 to vector<16x256xf32>
    %44 = arith.maximumf %42, %43 : vector<16x256xf32>
    %45 = arith.truncf %44 : vector<16x256xf32> to vector<16x256xbf16>
    %c0_43 = arith.constant 0 : index
    %c0_44 = arith.constant 0 : index
    %46 = vector.load %arg6[%c0_43, %c0_44] : memref<256x128xbf16, #tpu.memory_space<vmem>>, vector<256x128xbf16>
    %cst_45 = arith.constant dense<0.000000e+00> : vector<16x128xf32>
    %47 = tpu.matmul %45, %46, %cst_45 {dimension_numbers = #tpu.dot_dimension_numbers<[1], [0], [0], [1], [0, 0, 1, 1], [], []>} : vector<16x256xbf16>, vector<256x128xbf16>, vector<16x128xf32> -> vector<16x128xf32>
    %c0_46 = arith.constant 0 : index
    %c0_47 = arith.constant 0 : index
    %48 = vector.load %arg7[%c0_46, %c0_47] : memref<1x128xf32, #tpu.memory_space<vmem>>, vector<1x128xf32>
    %49 = vector.broadcast %48 : vector<1x128xf32> to vector<16x128xf32>
    %50 = arith.addf %47, %49 : vector<16x128xf32>
    %cst_48 = arith.constant 0.000000e+00 : f32
    %51 = vector.broadcast %cst_48 : f32 to vector<16x128xf32>
    %52 = arith.maximumf %50, %51 : vector<16x128xf32>
    %53 = arith.truncf %52 : vector<16x128xf32> to vector<16x128xbf16>
    %c0_49 = arith.constant 0 : index
    %c0_50 = arith.constant 0 : index
    %54 = vector.load %arg8[%c0_49, %c0_50] : memref<128x128xbf16, #tpu.memory_space<vmem>>, vector<128x128xbf16>
    %cst_51 = arith.constant dense<0.000000e+00> : vector<16x128xf32>
    %55 = tpu.matmul %53, %54, %cst_51 {dimension_numbers = #tpu.dot_dimension_numbers<[1], [0], [0], [1], [0, 0, 1, 1], [], []>} : vector<16x128xbf16>, vector<128x128xbf16>, vector<16x128xf32> -> vector<16x128xf32>
    %c0_52 = arith.constant 0 : index
    %c0_53 = arith.constant 0 : index
    %56 = vector.load %arg9[%c0_52, %c0_53] : memref<1x128xf32, #tpu.memory_space<vmem>>, vector<1x128xf32>
    %57 = vector.broadcast %56 : vector<1x128xf32> to vector<16x128xf32>
    %58 = arith.addf %55, %57 : vector<16x128xf32>
    %c0_54 = arith.constant 0 : index
    %c0_55 = arith.constant 0 : index
    %59 = vector.load %arg10[%c0_54, %c0_55] : memref<16x128xf32, #tpu.memory_space<vmem>>, vector<16x128xf32>
    tpu.vector_store %arg10[%c0_54, %c0_55], %58 {strides = array<i32>} : memref<16x128xf32, #tpu.memory_space<vmem>>, vector<16x128xf32>,
    return
  }
  func.func @transform_0(%arg0: i32) -> (i32, i32) {
    %c0_i32 = arith.constant 0 : i32
    %c0_i32_0 = arith.constant 0 : i32
    return %arg0, %c0_i32 : i32, i32
  }
  func.func @transform_1(%arg0: i32) -> (i32, i32) {
    %c0_i32 = arith.constant 0 : i32
    %c0_i32_0 = arith.constant 0 : i32
    %c0_i32_1 = arith.constant 0 : i32
    return %c0_i32, %c0_i32_0 : i32, i32
  }
  func.func @transform_2(%arg0: i32) -> (i32, i32) {
    %c0_i32 = arith.constant 0 : i32
    %c0_i32_0 = arith.constant 0 : i32
    %c0_i32_1 = arith.constant 0 : i32
    return %c0_i32, %c0_i32_0 : i32, i32
  }
  func.func @transform_3(%arg0: i32) -> (i32, i32, i32) {
    %c0_i32 = arith.constant 0 : i32
    %c0_i32_0 = arith.constant 0 : i32
    %c0_i32_1 = arith.constant 0 : i32
    %c0_i32_2 = arith.constant 0 : i32
    return %c0_i32, %c0_i32_0, %c0_i32_1 : i32, i32, i32
  }
  func.func @transform_4(%arg0: i32) -> (i32, i32) {
    %c0_i32 = arith.constant 0 : i32
    %c0_i32_0 = arith.constant 0 : i32
    %c0_i32_1 = arith.constant 0 : i32
    return %c0_i32, %c0_i32_0 : i32, i32
  }
  func.func @transform_5(%arg0: i32) -> (i32, i32) {
    %c0_i32 = arith.constant 0 : i32
    %c0_i32_0 = arith.constant 0 : i32
    %c0_i32_1 = arith.constant 0 : i32
    return %c0_i32, %c0_i32_0 : i32, i32
  }
  func.func @transform_6(%arg0: i32) -> (i32, i32) {
    %c0_i32 = arith.constant 0 : i32
    %c0_i32_0 = arith.constant 0 : i32
    %c0_i32_1 = arith.constant 0 : i32
    return %c0_i32, %c0_i32_0 : i32, i32
  }
  func.func @transform_7(%arg0: i32) -> (i32, i32) {
    %c0_i32 = arith.constant 0 : i32
    %c0_i32_0 = arith.constant 0 : i32
    %c0_i32_1 = arith.constant 0 : i32
    return %c0_i32, %c0_i32_0 : i32, i32
  }
  func.func @transform_8(%arg0: i32) -> (i32, i32) {
    %c0_i32 = arith.constant 0 : i32
    %c0_i32_0 = arith.constant 0 : i32
    %c0_i32_1 = arith.constant 0 : i32
    return %c0_i32, %c0_i32_0 : i32, i32
  }
  func.func @transform_9(%arg0: i32) -> (i32, i32) {
    %c0_i32 = arith.constant 0 : i32
    %c0_i32_0 = arith.constant 0 : i32
    return %arg0, %c0_i32 : i32, i32
  }
}

</mosaic_0001>

<bundles_post_ra>
// kernel: dqn_efficientnet_forward.2
= control target key start
LH: loop header
LB: loop body
LE: loop exit
PB: predicated region body
PF: predicated region fallthrough
CT: control target
= control target key end

     0   :  { %s1235_s12 = smov 0   ;;  %s1433_s0 = inlined_call_operand.vmem [shape: bf16[288,300], index: 0, kind: input, shape index: {}]   ;;  %s1434_s1 = inlined_call_operand.vmem [shape: bf16[300,32], index: 1, kind: input, shape index: {}]   ;;  %s1435_s2 = inlined_call_operand.vmem [shape: f32[1,32], index: 2, kind: input, shape index: {}]   ;;  %s1436_s3 = inlined_call_operand.vmem [shape: bf16[288,32], index: 3, kind: output, shape index: {}]  }
   0x1 LB: > { %s914_s13 = sadd.s32 4294967295, %s1211_s12   ;;  %p918_p0 = scmp.ge.s32.totalorder %s1211_s12, 1  ;;  %s1211_s12 = sphi %s1235_s12, %s13_s12  }
   0x2   : > { %p139_p1 = scmp.lt.s32.totalorder %s1211_s12, 3 }
   0x4   : > { %p140_p2 = pnand %p918_p0, %p139_p1 }
   0x5   : > { %s164_s20 = smul.u32 (!%p140_p2), 18, %s914_s13 }
   0x6   : > { %143 = sbr.rel (%p140_p2) target bundleno = 318 (0x13e), region = 32 }
   0x7   : > { %p165_p3 = scmp.lt.s32.totalorder (!%p140_p2), %s164_s20, 35 }
   0xb   : > { %v1150_v0 = vld [vmem:[%s1434_s1 + $0x78] sm:$0xff]   ;;  %v1213_v2 = vmov 0.0   ;;  %v1152_v3 = vld [vmem:[%s1434_s1 + $0x70] sm:$0xff]   ;;  %v1154_v5 = vld [vmem:[%s1434_s1 + $0x68] sm:$0xff]   ;;  %vm1214_vm0 = vmmov 0   ;;  %s1438_s20 = smov (!%p165_p3, %s164_s20), 35 }
   0xc   : > { %v1151_v1 = vld [vmem:[%s1434_s1 + $0x38] sm:$0xff]   ;;  %1097 = vmatprep.subr.bf16.mxu1 %v1213_v2  ;;  %1015 = vmatprep.subr.bf16.mxu0 %v1150_v0  ;;  %v1153_v4 = vld [vmem:[%s1434_s1 + $0x30] sm:$0xff]   ;;  %v1155_v6 = vld [vmem:[%s1434_s1 + $0x28] sm:$0xff]   ;;  %vm535_vm1 = vcmask 1045504   ;;  %s1139_s8 = smul.u32 12, %s1438_s20  ;;  %vm507_vm2 = vcmask 359424  }
   0xd   : > { %1016 = vmatpush3.bf16.msra.mxu0 %v1151_v1  ;;  %1103 = vmatprep.mubr.msk.bf16.mxu1 %vm1214_vm0, %v1213_v2  ;;  %v1156_v7 = vld [vmem:[%s1434_s1 + $0x60] sm:$0xff]   ;;  %v1158_v9 = vld [vmem:[%s1434_s1 + $0x58] sm:$0xff]   ;;  %v1162_v10 = vld [vmem:[%s1434_s1 + $0x90] sm:$0x3f]   ;;  %s920_s7 = sshll.u32 %s1438_s20, 2  ;;  %vm839_vm3 = vcmask 257024  }
   0xe   : > { %1017 = vmatprep.subr.bf16.mxu0 %v1152_v3  ;;  %v1157_v8 = vld [vmem:[%s1434_s1 + $0x20] sm:$0xff]   ;;  %v1159_v11 = vld [vmem:[%s1434_s1 + $0x18] sm:$0xff]   ;;  %v537_v12 = vsel %vm535_vm1, %v1162_v10, 0  ;;  %v1165_v13 = vld [vmem:[%s1434_s1 + $0x88] sm:$0xff]   ;;  %s1295_s21 = scalar_lea.vmem %s1433_s0, %s1139_s8  ;;  %s1376_s10 = scalar_lea.vmem %s1436_s3, %s920_s7 }
   0xf   : > { %1098 = vmatpush3.bf16.msra.mxu1 %v537_v12  ;;  %v1160_v14 = vld [vmem:[%s1434_s1 + $0x50] sm:$0xff]   ;;  %v1163_v16 = vld [vmem:[%s1434_s1 + $0x48] sm:$0xff]   ;;  %v1168_v17 = vld [vmem:[%s1434_s1 + $0x80] sm:$0xff]  }
  0x10   : > { %1099 = vmatprep.subr.bf16.mxu1 %v1213_v2  ;;  %v1161_v15 = vld [vmem:[%s1434_s1 + $0x10] sm:$0xff]   ;;  %v1164_v20 = vld [vmem:[%s1434_s1 + $0x8] sm:$0xff]   ;;  %v1166_v21 = vld [vmem:[%s1434_s1 + $0x40] sm:$0xff]  }
  0x11   : > { %1018 = vmatpush3.bf16.msra.mxu0 %v1153_v4  ;;  %v1171_v18 = vld [vmem:[%s1295_s21 + $0x4] ss:$12 sps:$4 sm:$0xff]   ;;  %v1172_v19 = vld [vmem:[%s1295_s21 + $0x8] ss:$12 sps:$4 sm:$0xff]   ;;  %v1169_v23 = vld [vmem:[%s1295_s21] ss:$12 sps:$4 sm:$0xff]  }
  0x12   : > { %1019 = vmatprep.subr.bf16.mxu0 %v1154_v5  ;;  %571 = vmatprep.mubr.bf16.mxu0 %v1171_v18  ;;  %v1167_v22 = vld [vmem:[%s1434_s1] sm:$0xff]   ;;  %v1173_v25 = vld [vmem:[%s1295_s21 + $0x1c] ss:$12 sps:$4 sm:$0xff]   ;;  %v1181_v31 = vld [vmem:[%s1295_s21 + $0x4c] ss:$12 sps:$4 sm:$0xff]  }
  0x13   : > { %1100 = vmatpush3.bf16.msra.mxu1 %v1165_v13  ;;  %v1176_v24 = vld [vmem:[%s1295_s21 + $0x20] ss:$12 sps:$4 sm:$0xff]   ;;  %v1175_v26 = vld [vmem:[%s1295_s21 + $0x18] ss:$12 sps:$4 sm:$0xff]   ;;  %v1179_v29 = vld [vmem:[%s1295_s21 + $0x30] ss:$12 sps:$4 sm:$0xff]  }
  0x14   : > { %1101 = vmatprep.subr.bf16.mxu1 %v1213_v2  ;;  %v1180_v27 = vld [vmem:[%s1295_s21 + $0x38] ss:$12 sps:$4 sm:$0xff]   ;;  %v1177_v28 = vld [vmem:[%s1295_s21 + $0x34] ss:$12 sps:$4 sm:$0xff]   ;;  %v1184_v30 = vld [vmem:[%s1295_s21 + $0x50] ss:$12 sps:$4 sm:$0xff]  }
  0x15   : > { %1020 = vmatpush3.bf16.msra.mxu0 %v1155_v6  ;;  %v1183_v32 = vld [vmem:[%s1295_s21 + $0x48] ss:$12 sps:$4 sm:$0xff]   ;;  %v1185_v34 = vld [vmem:[%s1295_s21 + $0x64] ss:$12 sps:$4 sm:$0xff]   ;;  %v1187_v35 = vld [vmem:[%s1295_s21 + $0x60] ss:$12 sps:$4 sm:$0xff]  }
  0x16   : > { %1021 = vmatprep.subr.bf16.mxu0 %v1156_v7  ;;  %v1188_v33 = vld [vmem:[%s1295_s21 + $0x68] ss:$12 sps:$4 sm:$0xff]   ;;  %v1192_v36 = vld [vmem:[%s1295_s21 + $0x80] ss:$12 sps:$4 sm:$0xff]   ;;  %v1191_v38 = vld [vmem:[%s1295_s21 + $0x78] ss:$12 sps:$4 sm:$0xff]  }
  0x17   : > { %1102 = vmatpush3.bf16.msra.mxu1 %v1168_v17  ;;  %v1189_v37 = vld [vmem:[%s1295_s21 + $0x7c] ss:$12 sps:$4 sm:$0xff]   ;;  %v1196_v39 = vld [vmem:[%s1295_s21 + $0x98] ss:$12 sps:$4 sm:$0xff]   ;;  %v1193_v40 = vld [vmem:[%s1295_s21 + $0x94] ss:$12 sps:$4 sm:$0xff]  }
  0x18   : > { %v1195_v41 = vld [vmem:[%s1295_s21 + $0x90] ss:$12 sps:$4 sm:$0xff]   ;;  %v1197_v43 = vld [vmem:[%s1295_s21 + $0xac] ss:$12 sps:$4 sm:$0xff]   ;;  %v1199_v44 = vld [vmem:[%s1295_s21 + $0xa8] ss:$12 sps:$4 sm:$0xff]  }
  0x19   : > { %1022 = vmatpush3.bf16.msra.mxu0 %v1157_v8  ;;  %v1200_v42 = vld [vmem:[%s1295_s21 + $0xb0] ss:$12 sps:$4 sm:$0xff]   ;;  %v1204_v45 = vld [vmem:[%s1295_s21 + $0xc8] ss:$12 sps:$4 sm:$0xff]   ;;  %v1203_v47 = vld [vmem:[%s1295_s21 + $0xc0] ss:$12 sps:$4 sm:$0xff]  }
  0x1a   : > { %1023 = vmatprep.subr.bf16.mxu0 %v1158_v9  ;;  %1104 = vmatmul.mubr.msk.bf16.vlgmr.msra.gmra.mxu1 %vm507_vm2, %v1172_v19  ;;  %v1201_v46 = vld [vmem:[%s1295_s21 + $0xc4] ss:$12 sps:$4 sm:$0xff]   ;;  %v1368_v54 = vld [vmem:[%s1435_s2] ss:$0 sm:$0xff] }
  0x1b   : > { %1107 = vmatprep.mubr.msk.bf16.mxu1 %vm1214_vm0, %v1213_v2 }
  0x1d   : > { %1024 = vmatpush3.bf16.msra.mxu0 %v1159_v11 }
  0x1e   : > { %1025 = vmatprep.subr.bf16.mxu0 %v1160_v14 }
  0x21   : > { %1026 = vmatpush3.bf16.msra.mxu0 %v1161_v15 }
  0x22   : > { %1027 = vmatprep.subr.bf16.mxu0 %v1163_v16  ;;  %1108 = vmatmul.mubr.msk.bf16.gmra.mxu1 %vm507_vm2, %v1176_v24 }
  0x23   : > { %1111 = vmatprep.mubr.msk.bf16.mxu1 %vm1214_vm0, %v1213_v2 }
  0x25   : > { %1028 = vmatpush3.bf16.msra.mxu0 %v1164_v20 }
  0x26   : > { %1029 = vmatprep.subr.bf16.mxu0 %v1166_v21 }
  0x29   : > { %1030 = vmatpush3.bf16.msra.mxu0 %v1167_v22 }
  0x2a   : > { %1112 = vmatmul.mubr.msk.bf16.gmra.mxu1 %vm507_vm2, %v1180_v27 }
  0x2b   : > { %1115 = vmatprep.mubr.msk.bf16.mxu1 %vm1214_vm0, %v1213_v2 }
  0x2c   : > { %572 = vmatmul.mubr.bf16.vlgmr.msra.gmra.mxu0 %v1169_v23 }
  0x2d   : > { %579 = vmatprep.mubr.bf16.mxu0 %v1173_v25 }
  0x32   : > { %1116 = vmatmul.mubr.msk.bf16.gmra.mxu1 %vm507_vm2, %v1184_v30 }
  0x33   : > { %1119 = vmatprep.mubr.msk.bf16.mxu1 %vm1214_vm0, %v1213_v2 }
  0x34   : > { %580 = vmatmul.mubr.bf16.gmra.mxu0 %v1175_v26 }
  0x35   : > { %587 = vmatprep.mubr.bf16.mxu0 %v1177_v28 }
  0x3a   : > { %1120 = vmatmul.mubr.msk.bf16.gmra.mxu1 %vm507_vm2, %v1188_v33 }
  0x3b   : > { %1123 = vmatprep.mubr.msk.bf16.mxu1 %vm1214_vm0, %v1213_v2 }
  0x3c   : > { %588 = vmatmul.mubr.bf16.gmra.mxu0 %v1179_v29 }
  0x3d   : > { %595 = vmatprep.mubr.bf16.mxu0 %v1181_v31 }
  0x42   : > { %1124 = vmatmul.mubr.msk.bf16.gmra.mxu1 %vm507_vm2, %v1192_v36 }
  0x43   : > { %1127 = vmatprep.mubr.msk.bf16.mxu1 %vm1214_vm0, %v1213_v2 }
  0x44   : > { %596 = vmatmul.mubr.bf16.gmra.mxu0 %v1183_v32 }
  0x45   : > { %603 = vmatprep.mubr.bf16.mxu0 %v1185_v34 }
  0x4a   : > { %1128 = vmatmul.mubr.msk.bf16.gmra.mxu1 %vm507_vm2, %v1196_v39 }
  0x4b   : > { %1131 = vmatprep.mubr.msk.bf16.mxu1 %vm1214_vm0, %v1213_v2 }
  0x4c   : > { %604 = vmatmul.mubr.bf16.gmra.mxu0 %v1187_v35 }
  0x4d   : > { %611 = vmatprep.mubr.bf16.mxu0 %v1189_v37 }
  0x52   : > { %1132 = vmatmul.mubr.msk.bf16.gmra.mxu1 %vm507_vm2, %v1200_v42 }
  0x53   : > { %1135 = vmatprep.mubr.msk.bf16.mxu1 %vm1214_vm0, %v1213_v2 }
  0x54   : > { %612 = vmatmul.mubr.bf16.gmra.mxu0 %v1191_v38 }
  0x55   : > { %619 = vmatprep.mubr.bf16.mxu0 %v1193_v40 }
  0x5a   : > { %1136 = vmatmul.mubr.msk.bf16.gmra.mxu1 %vm507_vm2, %v1204_v45 }
  0x5c   : > { %620 = vmatmul.mubr.bf16.gmra.mxu0 %v1195_v41 }
  0x5d   : > { %627 = vmatprep.mubr.bf16.mxu0 %v1197_v43 }
  0x64   : > { %628 = vmatmul.mubr.bf16.gmra.mxu0 %v1199_v44 }
  0x65   : > { %635 = vmatprep.mubr.bf16.mxu0 %v1201_v46 }
  0x6c   : > { %636 = vmatmul.mubr.bf16.gmra.mxu0 %v1203_v47 }
  0xda   : > { %v678_v48 = vpop.f32.mrf.mxu1 }
  0xdc   : > { %v1105_v49 = vpop.f32.mrf.mxu1 }
  0xde   : > { %v681_v50 = vpop.f32.mrf.mxu1 }
  0xe0   : > { %v1106_v51 = vpop.f32.mrf.mxu1 }
  0xe2   : > { %v686_v53 = vpop.f32.mrf.mxu1 }
  0xe4   : > { %v1109_v56 = vpop.f32.mrf.mxu1 }
  0xe6   : > { %v689_v59 = vpop.f32.mrf.mxu1 }
  0xe8   : > { %v1110_v62 = vpop.f32.mrf.mxu1 }
  0xea   : > { %v694_v2 = vpop.f32.mrf.mxu1 }
  0xec   : > { %v1031_v52 = vpop.f32.mrf.mxu0  ;;  %v1113_v6 = vpop.f32.mrf.mxu1 }
  0xee   : > { %v1032_v55 = vpop.f32.mrf.mxu0  ;;  %v697_v11 = vpop.f32.mrf.mxu1 }
  0xef   : > { %v1033_v57 = vadd.f32 %v1032_v55, %v1031_v52 }
  0xf0   : > { %v1034_v58 = vpop.f32.mrf.mxu0  ;;  %v1114_v15 = vpop.f32.mrf.mxu1 }
  0xf1   : > { %v574_v60 = vadd.f32 %v1033_v57, %v1368_v54 }
  0xf2   : > { %v1035_v61 = vpop.f32.mrf.mxu0  ;;  %v702_v20 = vpop.f32.mrf.mxu1 }
  0xf3   : > { %v679_v63 = vadd.f32 %v678_v48, %v574_v60  ;;  %v1036_v0 = vadd.f32 %v1035_v61, %v1034_v58 }
  0xf4   : > { %v1037_v1 = vpop.f32.mrf.mxu0  ;;  %v1117_v24 = vpop.f32.mrf.mxu1 }
  0xf5   : > { %v749_v3 = vmax.f32 %v679_v63, 0.0  ;;  %v577_v4 = vadd.f32 %v1036_v0, %v1368_v54 }
  0xf6   : > { %v1038_v5 = vpop.f32.mrf.mxu0  ;;  %v705_v29 = vpop.f32.mrf.mxu1 }
  0xf7   : > { %v997_v7 = vpack.c.bf16 %v749_v3, %v749_v3  ;;  %v682_v8 = vadd.f32 %v681_v50, %v577_v4  ;;  %v1039_v9 = vadd.f32 %v1038_v5, %v1037_v1 }
  0xf8   : > { %v1040_v10 = vpop.f32.mrf.mxu0  ;;  %v1118_v33 = vpop.f32.mrf.mxu1 }
  0xf9   : > { %840 = vst.msk [vmem:[%s1376_s10] sm:$0xf] %vm839_vm3, %v997_v7  ;;  %v750_v12 = vmax.f32 %v682_v8, 0.0  ;;  %v582_v13 = vadd.f32 %v1039_v9, %v1368_v54 }
  0xfa   : > { %v1041_v14 = vpop.f32.mrf.mxu0  ;;  %v710_v38 = vpop.f32.mrf.mxu1 }
  0xfb   : > { %v998_v16 = vpack.c.bf16 %v750_v12, %v750_v12  ;;  %v687_v17 = vadd.f32 %v686_v53, %v582_v13  ;;  %v1042_v18 = vadd.f32 %v1041_v14, %v1040_v10 }
  0xfc   : > { %v1043_v19 = vpop.f32.mrf.mxu0  ;;  %v1121_v42 = vpop.f32.mrf.mxu1 }
  0xfd   : > { %841 = vst.msk [vmem:[%s1376_s10 + $0x4] sm:$0xf] %vm839_vm3, %v998_v16  ;;  %v751_v21 = vmax.f32 %v687_v17, 0.0  ;;  %v585_v22 = vadd.f32 %v1042_v18, %v1368_v54 }
  0xfe   : > { %v1044_v23 = vpop.f32.mrf.mxu0  ;;  %v713_v47 = vpop.f32.mrf.mxu1 }
  0xff   : > { %v999_v25 = vpack.c.bf16 %v751_v21, %v751_v21  ;;  %v690_v26 = vadd.f32 %v689_v59, %v585_v22  ;;  %v1045_v27 = vadd.f32 %v1044_v23, %v1043_v19 }
 0x100   : > { %v1046_v28 = vpop.f32.mrf.mxu0  ;;  %v1122_v51 = vpop.f32.mrf.mxu1 }
 0x101   : > { %842 = vst.msk [vmem:[%s1376_s10 + $0x8] sm:$0xf] %vm839_vm3, %v999_v25  ;;  %v752_v30 = vmax.f32 %v690_v26, 0.0  ;;  %v590_v31 = vadd.f32 %v1045_v27, %v1368_v54 }
 0x102   : > { %v1047_v32 = vpop.f32.mrf.mxu0  ;;  %v718_v57 = vpop.f32.mrf.mxu1 }
 0x103   : > { %v1000_v34 = vpack.c.bf16 %v752_v30, %v752_v30  ;;  %v695_v35 = vadd.f32 %v694_v2, %v590_v31  ;;  %v1048_v36 = vadd.f32 %v1047_v32, %v1046_v28 }
 0x104   : > { %v1049_v37 = vpop.f32.mrf.mxu0  ;;  %v1125_v61 = vpop.f32.mrf.mxu1 }
 0x105   : > { %843 = vst.msk [vmem:[%s1376_s10 + $0xc] sm:$0xf] %vm839_vm3, %v1000_v34  ;;  %v753_v39 = vmax.f32 %v695_v35, 0.0  ;;  %v593_v40 = vadd.f32 %v1048_v36, %v1368_v54 }
 0x106   : > { %v1050_v41 = vpop.f32.mrf.mxu0  ;;  %v721_v2 = vpop.f32.mrf.mxu1 }
 0x107   : > { %v1001_v43 = vpack.c.bf16 %v753_v39, %v753_v39  ;;  %v698_v44 = vadd.f32 %v697_v11, %v593_v40  ;;  %v1051_v45 = vadd.f32 %v1050_v41, %v1049_v37 }
 0x108   : > { %v1052_v46 = vpop.f32.mrf.mxu0  ;;  %v1126_v6 = vpop.f32.mrf.mxu1 }
 0x109   : > { %844 = vst.msk [vmem:[%s1376_s10 + $0x10] sm:$0xf] %vm839_vm3, %v1001_v43  ;;  %v754_v48 = vmax.f32 %v698_v44, 0.0  ;;  %v598_v49 = vadd.f32 %v1051_v45, %v1368_v54 }
 0x10a   : > { %v1053_v50 = vpop.f32.mrf.mxu0  ;;  %v726_v11 = vpop.f32.mrf.mxu1 }
 0x10b   : > { %v1002_v52 = vpack.c.bf16 %v754_v48, %v754_v48  ;;  %v703_v53 = vadd.f32 %v702_v20, %v598_v49  ;;  %v1054_v55 = vadd.f32 %v1053_v50, %v1052_v46 }
 0x10c   : > { %v1055_v56 = vpop.f32.mrf.mxu0  ;;  %v1129_v15 = vpop.f32.mrf.mxu1 }
 0x10d   : > { %845 = vst.msk [vmem:[%s1376_s10 + $0x14] sm:$0xf] %vm839_vm3, %v1002_v52  ;;  %v755_v58 = vmax.f32 %v703_v53, 0.0  ;;  %v601_v59 = vadd.f32 %v1054_v55, %v1368_v54 }
 0x10e   : > { %v1056_v60 = vpop.f32.mrf.mxu0  ;;  %v729_v20 = vpop.f32.mrf.mxu1 }
 0x10f   : > { %v1003_v62 = vpack.c.bf16 %v755_v58, %v755_v58  ;;  %v706_v63 = vadd.f32 %v705_v29, %v601_v59  ;;  %v1057_v0 = vadd.f32 %v1056_v60, %v1055_v56 }
 0x110   : > { %v1058_v1 = vpop.f32.mrf.mxu0  ;;  %v1130_v24 = vpop.f32.mrf.mxu1 }
 0x111   : > { %846 = vst.msk [vmem:[%s1376_s10 + $0x18] sm:$0xf] %vm839_vm3, %v1003_v62  ;;  %v756_v3 = vmax.f32 %v706_v63, 0.0  ;;  %v606_v4 = vadd.f32 %v1057_v0, %v1368_v54 }
 0x112   : > { %v1059_v5 = vpop.f32.mrf.mxu0  ;;  %v734_v29 = vpop.f32.mrf.mxu1 }
 0x113   : > { %v1004_v7 = vpack.c.bf16 %v756_v3, %v756_v3  ;;  %v711_v8 = vadd.f32 %v710_v38, %v606_v4  ;;  %v1060_v9 = vadd.f32 %v1059_v5, %v1058_v1 }
 0x114   : > { %v1061_v10 = vpop.f32.mrf.mxu0  ;;  %v1133_v33 = vpop.f32.mrf.mxu1 }
 0x115   : > { %847 = vst.msk [vmem:[%s1376_s10 + $0x1c] sm:$0xf] %vm839_vm3, %v1004_v7  ;;  %v757_v12 = vmax.f32 %v711_v8, 0.0  ;;  %v609_v13 = vadd.f32 %v1060_v9, %v1368_v54 }
 0x116   : > { %v1062_v14 = vpop.f32.mrf.mxu0  ;;  %v737_v38 = vpop.f32.mrf.mxu1 }
 0x117   : > { %v1005_v16 = vpack.c.bf16 %v757_v12, %v757_v12  ;;  %v714_v17 = vadd.f32 %v713_v47, %v609_v13  ;;  %v1063_v18 = vadd.f32 %v1062_v14, %v1061_v10 }
 0x118   : > { %v1064_v19 = vpop.f32.mrf.mxu0  ;;  %v1134_v42 = vpop.f32.mrf.mxu1 }
 0x119   : > { %848 = vst.msk [vmem:[%s1376_s10 + $0x20] sm:$0xf] %vm839_vm3, %v1005_v16  ;;  %v758_v21 = vmax.f32 %v714_v17, 0.0  ;;  %v614_v22 = vadd.f32 %v1063_v18, %v1368_v54 }
 0x11a   : > { %v1065_v23 = vpop.f32.mrf.mxu0  ;;  %v742_v47 = vpop.f32.mrf.mxu1 }
 0x11b   : > { %v1006_v25 = vpack.c.bf16 %v758_v21, %v758_v21  ;;  %v719_v26 = vadd.f32 %v718_v57, %v614_v22  ;;  %v1066_v27 = vadd.f32 %v1065_v23, %v1064_v19 }
 0x11c   : > { %v1067_v28 = vpop.f32.mrf.mxu0  ;;  %v1137_v51 = vpop.f32.mrf.mxu1 }
 0x11d   : > { %849 = vst.msk [vmem:[%s1376_s10 + $0x24] sm:$0xf] %vm839_vm3, %v1006_v25  ;;  %v759_v30 = vmax.f32 %v719_v26, 0.0  ;;  %v617_v31 = vadd.f32 %v1066_v27, %v1368_v54 }
 0x11e   : > { %v1068_v32 = vpop.f32.mrf.mxu0  ;;  %v745_v57 = vpop.f32.mrf.mxu1 }
 0x11f   : > { %v1007_v34 = vpack.c.bf16 %v759_v30, %v759_v30  ;;  %v722_v35 = vadd.f32 %v721_v2, %v617_v31  ;;  %v1069_v36 = vadd.f32 %v1068_v32, %v1067_v28 }
 0x120   : > { %v1070_v37 = vpop.f32.mrf.mxu0  ;;  %v1138_v61 = vpop.f32.mrf.mxu1 }
 0x121   : > { %850 = vst.msk [vmem:[%s1376_s10 + $0x28] sm:$0xf] %vm839_vm3, %v1007_v34  ;;  %v760_v39 = vmax.f32 %v722_v35, 0.0  ;;  %v622_v40 = vadd.f32 %v1069_v36, %v1368_v54 }
 0x122   : > { %v1071_v41 = vpop.f32.mrf.mxu0 }
 0x123   : > { %v1008_v43 = vpack.c.bf16 %v760_v39, %v760_v39  ;;  %v727_v44 = vadd.f32 %v726_v11, %v622_v40  ;;  %v1072_v45 = vadd.f32 %v1071_v41, %v1070_v37 }
 0x124   : > { %v1073_v46 = vpop.f32.mrf.mxu0 }
 0x125   : > { %851 = vst.msk [vmem:[%s1376_s10 + $0x2c] sm:$0xf] %vm839_vm3, %v1008_v43  ;;  %v761_v48 = vmax.f32 %v727_v44, 0.0  ;;  %v625_v49 = vadd.f32 %v1072_v45, %v1368_v54 }
 0x126   : > { %v1074_v50 = vpop.f32.mrf.mxu0 }
 0x127   : > { %v1009_v52 = vpack.c.bf16 %v761_v48, %v761_v48  ;;  %v730_v53 = vadd.f32 %v729_v20, %v625_v49  ;;  %v1075_v55 = vadd.f32 %v1074_v50, %v1073_v46 }
 0x128   : > { %v1076_v56 = vpop.f32.mrf.mxu0 }
 0x129   : > { %852 = vst.msk [vmem:[%s1376_s10 + $0x30] sm:$0xf] %vm839_vm3, %v1009_v52  ;;  %v762_v58 = vmax.f32 %v730_v53, 0.0  ;;  %v630_v59 = vadd.f32 %v1075_v55, %v1368_v54 }
 0x12a   : > { %v1077_v60 = vpop.f32.mrf.mxu0 }
 0x12b   : > { %v1010_v62 = vpack.c.bf16 %v762_v58, %v762_v58  ;;  %v735_v63 = vadd.f32 %v734_v29, %v630_v59  ;;  %v1078_v0 = vadd.f32 %v1077_v60, %v1076_v56 }
 0x12c   : > { %v1079_v1 = vpop.f32.mrf.mxu0 }
 0x12d   : > { %853 = vst.msk [vmem:[%s1376_s10 + $0x34] sm:$0xf] %vm839_vm3, %v1010_v62  ;;  %v763_v2 = vmax.f32 %v735_v63, 0.0  ;;  %v633_v3 = vadd.f32 %v1078_v0, %v1368_v54 }
 0x12e   : > { %v1080_v4 = vpop.f32.mrf.mxu0 }
 0x12f   : > { %v1011_v5 = vpack.c.bf16 %v763_v2, %v763_v2  ;;  %v738_v6 = vadd.f32 %v737_v38, %v633_v3  ;;  %v1081_v7 = vadd.f32 %v1080_v4, %v1079_v1 }
 0x130   : > { %v1082_v8 = vpop.f32.mrf.mxu0 }
 0x131   : > { %854 = vst.msk [vmem:[%s1376_s10 + $0x38] sm:$0xf] %vm839_vm3, %v1011_v5  ;;  %v764_v9 = vmax.f32 %v738_v6, 0.0  ;;  %v638_v10 = vadd.f32 %v1081_v7, %v1368_v54 }
 0x132   : > { %v1083_v11 = vpop.f32.mrf.mxu0 }
 0x133   : > { %v1012_v12 = vpack.c.bf16 %v764_v9, %v764_v9  ;;  %v743_v13 = vadd.f32 %v742_v47, %v638_v10  ;;  %v1084_v14 = vadd.f32 %v1083_v11, %v1082_v8 }
 0x135   : > { %855 = vst.msk [vmem:[%s1376_s10 + $0x3c] sm:$0xf] %vm839_vm3, %v1012_v12  ;;  %v765_v15 = vmax.f32 %v743_v13, 0.0  ;;  %v641_v16 = vadd.f32 %v1084_v14, %v1368_v54 }
 0x137   : > { %v1013_v17 = vpack.c.bf16 %v765_v15, %v765_v15  ;;  %v746_v18 = vadd.f32 %v745_v57, %v641_v16 }
 0x139   : > { %856 = vst.msk [vmem:[%s1376_s10 + $0x40] sm:$0xf] %vm839_vm3, %v1013_v17  ;;  %v766_v19 = vmax.f32 %v746_v18, 0.0 }
 0x13b   : > { %v1014_v20 = vpack.c.bf16 %v766_v19, %v766_v19 }
 0x13d   : > { %857 = vst.msk [vmem:[%s1376_s10 + $0x44] sm:$0xf] %vm839_vm3, %v1014_v20 }
 0x13e PF: > { %s13_s12 = sadd.s32 1, %s1211_s12  }
 0x13f   : > { %p10_p4 = scmp.ge.s32.totalorder %s13_s12, 4  }
 0x141   :  { %12 = sbr.rel (!%p10_p4) target bundleno = 1 (0x1), region = 62 }

// kernel: dqn_efficientnet_forward.3
= control target key start
LH: loop header
LB: loop body
LE: loop exit
PB: predicated region body
PF: predicated region fallthrough
CT: control target
= control target key end

     0   :  { %vm3869_vm0 = vmmov 0   ;;  %s4924_s1 = inlined_call_operand.vmem [shape: bf16[2048,128], index: 1, kind: input, shape index: {}]   ;;  %s4925_s0 = inlined_call_operand.vmem [shape: bf16[64,2048], index: 0, kind: input, shape index: {}]   ;;  %s4926_s3 = inlined_call_operand.vmem [shape: bf16[4,128,256], index: 3, kind: input, shape index: {}]   ;;  %s4927_s2 = inlined_call_operand.vmem [shape: f32[1,128], index: 2, kind: input, shape index: {}]   ;;  %s4928_s5 = inlined_call_operand.vmem [shape: bf16[256,128], index: 5, kind: input, shape index: {}]   ;;  %s4929_s7 = inlined_call_operand.vmem [shape: bf16[128,128], index: 7, kind: input, shape index: {}]   ;;  %s4930_s4 = inlined_call_operand.vmem [shape: f32[1,256], index: 4, kind: input, shape index: {}]   ;;  %s4931_s6 = inlined_call_operand.vmem [shape: f32[1,128], index: 6, kind: input, shape index: {}]   ;;  %s4932_s8 = inlined_call_operand.vmem [shape: f32[1,128], index: 8, kind: input, shape index: {}]   ;;  %s4933_s9 = inlined_call_operand.vmem [shape: f32[16,128], index: 9, kind: output, shape index: {}]  }
   0x1   :  { %v3619_v0 = vld [vmem:[%s4924_s1 + $0x78] sm:$0xff]   ;;  %v3623_v4 = vld [vmem:[%s4924_s1 + $0x70] sm:$0xff]   ;;  %v3627_v8 = vld [vmem:[%s4924_s1 + $0x68] sm:$0xff]  }
   0x2   :  { %v3620_v1 = vld [vmem:[%s4924_s1 + $0xf8] sm:$0xff]   ;;  %3245 = vmatprep.subr.bf16.mxu0 %v3619_v0  ;;  %v3624_v5 = vld [vmem:[%s4924_s1 + $0xf0] sm:$0xff]   ;;  %v3628_v9 = vld [vmem:[%s4924_s1 + $0xe8] sm:$0xff]  }
   0x3   :  { %v3621_v2 = vld [vmem:[%s4924_s1 + $0x38] sm:$0xff]   ;;  %3285 = vmatprep.subr.bf16.mxu1 %v3620_v1  ;;  %v3625_v6 = vld [vmem:[%s4924_s1 + $0x30] sm:$0xff]   ;;  %v3629_v10 = vld [vmem:[%s4924_s1 + $0x28] sm:$0xff]  }
   0x4   :  { %v3622_v3 = vld [vmem:[%s4924_s1 + $0xb8] sm:$0xff]   ;;  %3246 = vmatpush3.bf16.msra.mxu0 %v3621_v2  ;;  %v3626_v7 = vld [vmem:[%s4924_s1 + $0xb0] sm:$0xff]   ;;  %v3630_v11 = vld [vmem:[%s4924_s1 + $0xa8] sm:$0xff]  }
   0x5   :  { %3286 = vmatpush3.bf16.msra.mxu1 %v3622_v3  ;;  %3247 = vmatprep.subr.bf16.mxu0 %v3623_v4  ;;  %v3631_v12 = vld [vmem:[%s4924_s1 + $0x60] sm:$0xff]   ;;  %v3635_v16 = vld [vmem:[%s4924_s1 + $0x58] sm:$0xff]   ;;  %v3639_v20 = vld [vmem:[%s4924_s1 + $0x50] sm:$0xff]  }
   0x6   :  { %3287 = vmatprep.subr.bf16.mxu1 %v3624_v5  ;;  %v3632_v13 = vld [vmem:[%s4924_s1 + $0xe0] sm:$0xff]   ;;  %v3636_v17 = vld [vmem:[%s4924_s1 + $0xd8] sm:$0xff]   ;;  %v3640_v21 = vld [vmem:[%s4924_s1 + $0xd0] sm:$0xff]  }
   0x7   :  { %v3633_v14 = vld [vmem:[%s4924_s1 + $0x20] sm:$0xff]   ;;  %v3637_v18 = vld [vmem:[%s4924_s1 + $0x18] sm:$0xff]   ;;  %v3641_v22 = vld [vmem:[%s4924_s1 + $0x10] sm:$0xff]  }
   0x8   :  { %3248 = vmatpush3.bf16.msra.mxu0 %v3625_v6  ;;  %v3634_v15 = vld [vmem:[%s4924_s1 + $0xa0] sm:$0xff]   ;;  %v3638_v19 = vld [vmem:[%s4924_s1 + $0x98] sm:$0xff]   ;;  %v3642_v23 = vld [vmem:[%s4924_s1 + $0x90] sm:$0xff]  }
   0x9   :  { %3288 = vmatpush3.bf16.msra.mxu1 %v3626_v7  ;;  %3249 = vmatprep.subr.bf16.mxu0 %v3627_v8  ;;  %v3643_v24 = vld [vmem:[%s4924_s1 + $0x48] sm:$0xff]   ;;  %v3647_v28 = vld [vmem:[%s4924_s1 + $0x40] sm:$0xff]   ;;  %v3651_v40 = vld [vmem:[%s4924_s1 + $0x178] sm:$0xff]  }
   0xa   :  { %3289 = vmatprep.subr.bf16.mxu1 %v3628_v9  ;;  %v3644_v25 = vld [vmem:[%s4924_s1 + $0xc8] sm:$0xff]   ;;  %v3648_v29 = vld [vmem:[%s4924_s1 + $0xc0] sm:$0xff]   ;;  %v3652_v41 = vld [vmem:[%s4924_s1 + $0x1f8] sm:$0xff]  }
   0xb   :  { %v3645_v26 = vld [vmem:[%s4924_s1 + $0x8] sm:$0xff]   ;;  %v3649_v30 = vld [vmem:[%s4924_s1] sm:$0xff]   ;;  %v3653_v42 = vld [vmem:[%s4924_s1 + $0x138] sm:$0xff]  }
   0xc   :  { %3250 = vmatpush3.bf16.msra.mxu0 %v3629_v10  ;;  %v3646_v27 = vld [vmem:[%s4924_s1 + $0x88] sm:$0xff]   ;;  %v3650_v31 = vld [vmem:[%s4924_s1 + $0x80] sm:$0xff]   ;;  %v3654_v43 = vld [vmem:[%s4924_s1 + $0x1b8] sm:$0xff]  }
   0xd   :  { %3290 = vmatpush3.bf16.msra.mxu1 %v3630_v11  ;;  %3251 = vmatprep.subr.bf16.mxu0 %v3631_v12  ;;  %v33_v32 = vld [vmem:[%s4925_s0] sm:$0xff]  ;;  %v34_v34 = vld [vmem:[%s4925_s0 + $0x8] sm:$0xff]  ;;  %v3655_v44 = vld [vmem:[%s4924_s1 + $0x170] sm:$0xff]  }
   0xe   :  { %3291 = vmatprep.subr.bf16.mxu1 %v3632_v13  ;;  %v41_v33 = vld [vmem:[%s4925_s0 + $0x40] sm:$0xff]  ;;  %v42_v37 = vld [vmem:[%s4925_s0 + $0x48] sm:$0xff]  ;;  %v3656_v45 = vld [vmem:[%s4924_s1 + $0x1f0] sm:$0xff]  }
   0xf   :  { %v2915_v35 = vcombine.low %v33_v32, %v41_v33  ;;  %v2916_v36 = vcombine.high %v33_v32, %v41_v33  ;;  %v2917_v38 = vcombine.low %v34_v34, %v42_v37  ;;  %v2918_v39 = vcombine.high %v34_v34, %v42_v37  ;;  %v3657_v46 = vld [vmem:[%s4924_s1 + $0x130] sm:$0xff]   ;;  %v49_v48 = vld [vmem:[%s4925_s0 + $0x80] sm:$0xff]  ;;  %v50_v51 = vld [vmem:[%s4925_s0 + $0x88] sm:$0xff] }
  0x10   :  { %3252 = vmatpush3.bf16.msra.mxu0 %v3633_v14  ;;  %v3658_v47 = vld [vmem:[%s4924_s1 + $0x1b0] sm:$0xff]   ;;  %v57_v49 = vld [vmem:[%s4925_s0 + $0xc0] sm:$0xff]  ;;  %v58_v52 = vld [vmem:[%s4925_s0 + $0xc8] sm:$0xff] }
  0x11   :  { %3292 = vmatpush3.bf16.msra.mxu1 %v3634_v15  ;;  %3253 = vmatprep.subr.bf16.mxu0 %v3635_v16  ;;  %v2932_v50 = vcombine.high %v49_v48, %v57_v49  ;;  %v2931_v53 = vcombine.low %v49_v48, %v57_v49  ;;  %v2934_v54 = vcombine.high %v50_v51, %v58_v52  ;;  %v3659_v56 = vld [vmem:[%s4924_s1 + $0x168] sm:$0xff]   ;;  %v3663_v60 = vld [vmem:[%s4924_s1 + $0x160] sm:$0xff]   ;;  %v3667_v8 = vld [vmem:[%s4924_s1 + $0x158] sm:$0xff]  }
  0x12   :  { %3293 = vmatprep.subr.bf16.mxu1 %v3636_v17  ;;  %1480 = vmatprep.mubr.bf16.mxu0 %v2916_v36  ;;  %v2933_v55 = vcombine.low %v50_v51, %v58_v52  ;;  %v3660_v57 = vld [vmem:[%s4924_s1 + $0x1e8] sm:$0xff]   ;;  %v3664_v61 = vld [vmem:[%s4924_s1 + $0x1e0] sm:$0xff]   ;;  %v3668_v9 = vld [vmem:[%s4924_s1 + $0x1d8] sm:$0xff]  }
  0x13   :  { %1545 = vmatprep.mubr.bf16.mxu1 %v2918_v39  ;;  %v3661_v58 = vld [vmem:[%s4924_s1 + $0x128] sm:$0xff]   ;;  %v3665_v62 = vld [vmem:[%s4924_s1 + $0x120] sm:$0xff]   ;;  %v3669_v10 = vld [vmem:[%s4924_s1 + $0x118] sm:$0xff]  }
  0x14   :  { %3254 = vmatpush3.bf16.msra.mxu0 %v3637_v18  ;;  %v3662_v59 = vld [vmem:[%s4924_s1 + $0x1a8] sm:$0xff]   ;;  %v3666_v63 = vld [vmem:[%s4924_s1 + $0x1a0] sm:$0xff]   ;;  %v3670_v11 = vld [vmem:[%s4924_s1 + $0x198] sm:$0xff]  }
  0x15   :  { %3294 = vmatpush3.bf16.msra.mxu1 %v3638_v19  ;;  %3255 = vmatprep.subr.bf16.mxu0 %v3639_v20  ;;  %v65_v0 = vld [vmem:[%s4925_s0 + $0x100] sm:$0xff]  ;;  %v66_v2 = vld [vmem:[%s4925_s0 + $0x108] sm:$0xff]  ;;  %v3671_v12 = vld [vmem:[%s4924_s1 + $0x150] sm:$0xff]  }
  0x16   :  { %3295 = vmatprep.subr.bf16.mxu1 %v3640_v21  ;;  %v73_v1 = vld [vmem:[%s4925_s0 + $0x140] sm:$0xff]  ;;  %v74_v3 = vld [vmem:[%s4925_s0 + $0x148] sm:$0xff]  ;;  %v3672_v13 = vld [vmem:[%s4924_s1 + $0x1d0] sm:$0xff]  }
  0x17   :  { %v2948_v4 = vcombine.high %v65_v0, %v73_v1  ;;  %v2950_v5 = vcombine.high %v66_v2, %v74_v3  ;;  %v2947_v6 = vcombine.low %v65_v0, %v73_v1  ;;  %v2949_v7 = vcombine.low %v66_v2, %v74_v3  ;;  %v3673_v14 = vld [vmem:[%s4924_s1 + $0x110] sm:$0xff]   ;;  %v81_v16 = vld [vmem:[%s4925_s0 + $0x180] sm:$0xff]  ;;  %v82_v18 = vld [vmem:[%s4925_s0 + $0x188] sm:$0xff] }
  0x18   :  { %3256 = vmatpush3.bf16.msra.mxu0 %v3641_v22  ;;  %v3674_v15 = vld [vmem:[%s4924_s1 + $0x190] sm:$0xff]   ;;  %v89_v17 = vld [vmem:[%s4925_s0 + $0x1c0] sm:$0xff]  ;;  %v90_v20 = vld [vmem:[%s4925_s0 + $0x1c8] sm:$0xff] }
  0x19   :  { %3296 = vmatpush3.bf16.msra.mxu1 %v3642_v23  ;;  %3257 = vmatprep.subr.bf16.mxu0 %v3643_v24  ;;  %v2964_v19 = vcombine.high %v81_v16, %v89_v17  ;;  %v2963_v21 = vcombine.low %v81_v16, %v89_v17  ;;  %v2966_v22 = vcombine.high %v82_v18, %v90_v20  ;;  %v3675_v24 = vld [vmem:[%s4924_s1 + $0x148] sm:$0xff]   ;;  %v35_v32 = vld [vmem:[%s4925_s0 + $0x10] sm:$0xff]  ;;  %v36_v36 = vld [vmem:[%s4925_s0 + $0x18] sm:$0xff] }
  0x1a   :  { %3297 = vmatprep.subr.bf16.mxu1 %v3644_v25  ;;  %v2965_v23 = vcombine.low %v82_v18, %v90_v20  ;;  %v3676_v25 = vld [vmem:[%s4924_s1 + $0x1c8] sm:$0xff]   ;;  %v43_v33 = vld [vmem:[%s4925_s0 + $0x50] sm:$0xff]  ;;  %v44_v37 = vld [vmem:[%s4925_s0 + $0x58] sm:$0xff] }
  0x1b   :  { %v2919_v34 = vcombine.low %v35_v32, %v43_v33  ;;  %v2922_v39 = vcombine.high %v36_v36, %v44_v37  ;;  %v51_v48 = vld [vmem:[%s4925_s0 + $0x90] sm:$0xff]  ;;  %v60_v51 = vld [vmem:[%s4925_s0 + $0xd8] sm:$0xff] }
  0x1c   :  { %3258 = vmatpush3.bf16.msra.mxu0 %v3645_v26  ;;  %v3677_v26 = vld [vmem:[%s4924_s1 + $0x108] sm:$0xff]   ;;  %v59_v49 = vld [vmem:[%s4925_s0 + $0xd0] sm:$0xff]  ;;  %v68_v2 = vld [vmem:[%s4925_s0 + $0x118] sm:$0xff] }
  0x1d   :  { %3298 = vmatpush3.bf16.msra.mxu1 %v3646_v27  ;;  %3259 = vmatprep.subr.bf16.mxu0 %v3647_v28  ;;  %v3678_v27 = vld [vmem:[%s4924_s1 + $0x188] sm:$0xff]   ;;  %v3679_v28 = vld [vmem:[%s4924_s1 + $0x140] sm:$0xff]   ;;  %v2936_v52 = vcombine.high %v51_v48, %v59_v49  ;;  %v67_v0 = vld [vmem:[%s4925_s0 + $0x110] sm:$0xff] }
  0x1e   :  { %3299 = vmatprep.subr.bf16.mxu1 %v3648_v29  ;;  %v3680_v29 = vld [vmem:[%s4924_s1 + $0x1c0] sm:$0xff]   ;;  %v75_v1 = vld [vmem:[%s4925_s0 + $0x150] sm:$0xff]  ;;  %v92_v20 = vld [vmem:[%s4925_s0 + $0x1d8] sm:$0xff] }
  0x1f   :  { %v2952_v3 = vcombine.high %v67_v0, %v75_v1  ;;  %v83_v16 = vld [vmem:[%s4925_s0 + $0x190] sm:$0xff] }
  0x20   :  { %3260 = vmatpush3.bf16.msra.mxu0 %v3649_v30  ;;  %v3681_v30 = vld [vmem:[%s4924_s1 + $0x100] sm:$0xff]   ;;  %v91_v17 = vld [vmem:[%s4925_s0 + $0x1d0] sm:$0xff] }
  0x21   :  { %3300 = vmatpush3.bf16.msra.mxu1 %v3650_v31  ;;  %3325 = vmatprep.subr.bf16.mxu0 %v3651_v40  ;;  %v3682_v31 = vld [vmem:[%s4924_s1 + $0x180] sm:$0xff]   ;;  %v3683_v40 = vld [vmem:[%s4924_s1 + $0x278] sm:$0xff]   ;;  %v2968_v18 = vcombine.high %v83_v16, %v91_v17 }
  0x22   :  { %3365 = vmatprep.subr.bf16.mxu1 %v3652_v41  ;;  %v3684_v41 = vld [vmem:[%s4924_s1 + $0x2f8] sm:$0xff]  }
  0x23   :  { %1481 = vmatmul.mubr.bf16.vlgmr.msra.gmra.mxu0 %v2915_v35  ;;  %v2920_v35 = vcombine.high %v35_v32, %v43_v33  ;;  %v37_v32 = vld [vmem:[%s4925_s0 + $0x20] sm:$0xff] }
  0x24   :  { %1546 = vmatmul.mubr.bf16.vlgmr.msra.gmra.mxu1 %v2917_v38  ;;  %3326 = vmatpush3.bf16.msra.mxu0 %v3653_v42  ;;  %v2921_v38 = vcombine.low %v36_v36, %v44_v37  ;;  %v3685_v42 = vld [vmem:[%s4924_s1 + $0x238] sm:$0xff]   ;;  %v45_v33 = vld [vmem:[%s4925_s0 + $0x60] sm:$0xff] }
  0x25   :  { %3366 = vmatpush3.bf16.msra.mxu1 %v3654_v43  ;;  %3327 = vmatprep.subr.bf16.mxu0 %v3655_v44  ;;  %v3686_v43 = vld [vmem:[%s4924_s1 + $0x2b8] sm:$0xff]   ;;  %v3687_v44 = vld [vmem:[%s4924_s1 + $0x270] sm:$0xff]   ;;  %v2923_v36 = vcombine.low %v37_v32, %v45_v33  ;;  %v2924_v37 = vcombine.high %v37_v32, %v45_v33 }
  0x26   :  { %3367 = vmatprep.subr.bf16.mxu1 %v3656_v45  ;;  %1488 = vmatprep.mubr.bf16.mxu0 %v2932_v50  ;;  %v3688_v45 = vld [vmem:[%s4924_s1 + $0x2f0] sm:$0xff]   ;;  %v52_v50 = vld [vmem:[%s4925_s0 + $0x98] sm:$0xff] }
  0x27   :  { %1553 = vmatprep.mubr.bf16.mxu1 %v2934_v54  ;;  %v2935_v54 = vcombine.low %v51_v48, %v59_v49  ;;  %v53_v48 = vld [vmem:[%s4925_s0 + $0xa0] sm:$0xff]  ;;  %v39_v32 = vld [vmem:[%s4925_s0 + $0x30] sm:$0xff] }
  0x28   :  { %3328 = vmatpush3.bf16.msra.mxu0 %v3657_v46  ;;  %v3689_v46 = vld [vmem:[%s4924_s1 + $0x230] sm:$0xff]   ;;  %v61_v49 = vld [vmem:[%s4925_s0 + $0xe0] sm:$0xff] }
  0x29   :  { %3368 = vmatpush3.bf16.msra.mxu1 %v3658_v47  ;;  %3329 = vmatprep.subr.bf16.mxu0 %v3659_v56  ;;  %v3690_v47 = vld [vmem:[%s4924_s1 + $0x2b0] sm:$0xff]   ;;  %v3691_v56 = vld [vmem:[%s4924_s1 + $0x268] sm:$0xff]  }
  0x2a   :  { %3369 = vmatprep.subr.bf16.mxu1 %v3660_v57  ;;  %v3692_v57 = vld [vmem:[%s4924_s1 + $0x2e8] sm:$0xff]   ;;  %v47_v33 = vld [vmem:[%s4925_s0 + $0x70] sm:$0xff] }
  0x2b   :  { %1489 = vmatmul.mubr.bf16.gmra.mxu0 %v2931_v53  ;;  %v2938_v53 = vcombine.high %v52_v50, %v60_v51 }
  0x2c   :  { %1554 = vmatmul.mubr.bf16.gmra.mxu1 %v2933_v55  ;;  %3330 = vmatpush3.bf16.msra.mxu0 %v3661_v58  ;;  %v2937_v55 = vcombine.low %v52_v50, %v60_v51  ;;  %v3693_v58 = vld [vmem:[%s4924_s1 + $0x228] sm:$0xff]   ;;  %v2940_v51 = vcombine.high %v53_v48, %v61_v49 }
  0x2d   :  { %3370 = vmatpush3.bf16.msra.mxu1 %v3662_v59  ;;  %3331 = vmatprep.subr.bf16.mxu0 %v3663_v60  ;;  %v3694_v59 = vld [vmem:[%s4924_s1 + $0x2a8] sm:$0xff]   ;;  %v3695_v60 = vld [vmem:[%s4924_s1 + $0x260] sm:$0xff]  }
  0x2e   :  { %3371 = vmatprep.subr.bf16.mxu1 %v3664_v61  ;;  %1496 = vmatprep.mubr.bf16.mxu0 %v2948_v4  ;;  %v3696_v61 = vld [vmem:[%s4924_s1 + $0x2e0] sm:$0xff]   ;;  %v76_v4 = vld [vmem:[%s4925_s0 + $0x158] sm:$0xff]  ;;  %v54_v50 = vld [vmem:[%s4925_s0 + $0xa8] sm:$0xff] }
  0x2f   :  { %1561 = vmatprep.mubr.bf16.mxu1 %v2950_v5  ;;  %v2951_v5 = vcombine.low %v67_v0, %v75_v1  ;;  %v69_v0 = vld [vmem:[%s4925_s0 + $0x120] sm:$0xff] }
  0x30   :  { %3332 = vmatpush3.bf16.msra.mxu0 %v3665_v62  ;;  %v3697_v62 = vld [vmem:[%s4924_s1 + $0x220] sm:$0xff]  }
  0x31   :  { %3372 = vmatpush3.bf16.msra.mxu1 %v3666_v63  ;;  %3333 = vmatprep.subr.bf16.mxu0 %v3667_v8  ;;  %v3698_v63 = vld [vmem:[%s4924_s1 + $0x2a0] sm:$0xff]   ;;  %v3699_v8 = vld [vmem:[%s4924_s1 + $0x258] sm:$0xff]  }
  0x32   :  { %3373 = vmatprep.subr.bf16.mxu1 %v3668_v9  ;;  %v3700_v9 = vld [vmem:[%s4924_s1 + $0x2d8] sm:$0xff]   ;;  %v77_v1 = vld [vmem:[%s4925_s0 + $0x160] sm:$0xff] }
  0x33   :  { %1497 = vmatmul.mubr.bf16.gmra.mxu0 %v2947_v6  ;;  %v2954_v6 = vcombine.high %v68_v2, %v76_v4 }
  0x34   :  { %1562 = vmatmul.mubr.bf16.gmra.mxu1 %v2949_v7  ;;  %3334 = vmatpush3.bf16.msra.mxu0 %v3669_v10  ;;  %v2953_v7 = vcombine.low %v68_v2, %v76_v4  ;;  %v3701_v10 = vld [vmem:[%s4924_s1 + $0x218] sm:$0xff]   ;;  %v2956_v2 = vcombine.high %v69_v0, %v77_v1  ;;  %v78_v4 = vld [vmem:[%s4925_s0 + $0x168] sm:$0xff] }
  0x35   :  { %3374 = vmatpush3.bf16.msra.mxu1 %v3670_v11  ;;  %3335 = vmatprep.subr.bf16.mxu0 %v3671_v12  ;;  %v3702_v11 = vld [vmem:[%s4924_s1 + $0x298] sm:$0xff]   ;;  %v3703_v12 = vld [vmem:[%s4924_s1 + $0x250] sm:$0xff]  }
  0x36   :  { %3375 = vmatprep.subr.bf16.mxu1 %v3672_v13  ;;  %1504 = vmatprep.mubr.bf16.mxu0 %v2964_v19  ;;  %v3704_v13 = vld [vmem:[%s4924_s1 + $0x2d0] sm:$0xff]   ;;  %v84_v19 = vld [vmem:[%s4925_s0 + $0x198] sm:$0xff] }
  0x37   :  { %1569 = vmatprep.mubr.bf16.mxu1 %v2966_v22  ;;  %v2970_v22 = vcombine.high %v84_v19, %v92_v20 }
  0x38   :  { %3336 = vmatpush3.bf16.msra.mxu0 %v3673_v14  ;;  %v3705_v14 = vld [vmem:[%s4924_s1 + $0x210] sm:$0xff]  }
  0x39   :  { %3376 = vmatpush3.bf16.msra.mxu1 %v3674_v15  ;;  %3337 = vmatprep.subr.bf16.mxu0 %v3675_v24  ;;  %v3706_v15 = vld [vmem:[%s4924_s1 + $0x290] sm:$0xff]   ;;  %v3707_v24 = vld [vmem:[%s4924_s1 + $0x248] sm:$0xff]  }
  0x3a   :  { %3377 = vmatprep.subr.bf16.mxu1 %v3676_v25  ;;  %v3708_v25 = vld [vmem:[%s4924_s1 + $0x2c8] sm:$0xff]  }
  0x3b   :  { %1505 = vmatmul.mubr.bf16.gmra.mxu0 %v2963_v21  ;;  %v2967_v21 = vcombine.low %v83_v16, %v91_v17  ;;  %v85_v16 = vld [vmem:[%s4925_s0 + $0x1a0] sm:$0xff] }
  0x3c   :  { %1570 = vmatmul.mubr.bf16.gmra.mxu1 %v2965_v23  ;;  %3338 = vmatpush3.bf16.msra.mxu0 %v3677_v26  ;;  %v2969_v23 = vcombine.low %v84_v19, %v92_v20  ;;  %v3709_v26 = vld [vmem:[%s4924_s1 + $0x208] sm:$0xff]   ;;  %v93_v17 = vld [vmem:[%s4925_s0 + $0x1e0] sm:$0xff] }
  0x3d   :  { %3378 = vmatpush3.bf16.msra.mxu1 %v3678_v27  ;;  %3339 = vmatprep.subr.bf16.mxu0 %v3679_v28  ;;  %v3710_v27 = vld [vmem:[%s4924_s1 + $0x288] sm:$0xff]   ;;  %v3711_v28 = vld [vmem:[%s4924_s1 + $0x240] sm:$0xff]   ;;  %v2972_v20 = vcombine.high %v85_v16, %v93_v17 }
  0x3e   :  { %3379 = vmatprep.subr.bf16.mxu1 %v3680_v29  ;;  %1610 = vmatprep.mubr.bf16.mxu0 %v2920_v35  ;;  %v3712_v29 = vld [vmem:[%s4924_s1 + $0x2c0] sm:$0xff]   ;;  %v46_v35 = vld [vmem:[%s4925_s0 + $0x68] sm:$0xff] }
  0x3f   :  { %1675 = vmatprep.mubr.bf16.mxu1 %v2922_v39  ;;  %v94_v19 = vld [vmem:[%s4925_s0 + $0x1e8] sm:$0xff] }
  0x40   :  { %3340 = vmatpush3.bf16.msra.mxu0 %v3681_v30  ;;  %v3713_v30 = vld [vmem:[%s4924_s1 + $0x200] sm:$0xff]  }
  0x41   :  { %3380 = vmatpush3.bf16.msra.mxu1 %v3682_v31  ;;  %3405 = vmatprep.subr.bf16.mxu0 %v3683_v40  ;;  %v3714_v31 = vld [vmem:[%s4924_s1 + $0x280] sm:$0xff]   ;;  %v3715_v40 = vld [vmem:[%s4924_s1 + $0x378] sm:$0xff]  }
  0x42   :  { %3445 = vmatprep.subr.bf16.mxu1 %v3684_v41  ;;  %v3716_v41 = vld [vmem:[%s4924_s1 + $0x3f8] sm:$0xff]  }
  0x43   :  { %1611 = vmatmul.mubr.bf16.vlgmr.msra.gmra.mxu0 %v2919_v34  ;;  %v38_v34 = vld [vmem:[%s4925_s0 + $0x28] sm:$0xff] }
  0x44   :  { %1676 = vmatmul.mubr.bf16.vlgmr.msra.gmra.mxu1 %v2921_v38  ;;  %3406 = vmatpush3.bf16.msra.mxu0 %v3685_v42  ;;  %v2925_v38 = vcombine.low %v38_v34, %v46_v35  ;;  %v2926_v39 = vcombine.high %v38_v34, %v46_v35  ;;  %v3717_v42 = vld [vmem:[%s4924_s1 + $0x338] sm:$0xff]   ;;  %v2927_v35 = vcombine.low %v39_v32, %v47_v33 }
  0x45   :  { %3446 = vmatpush3.bf16.msra.mxu1 %v3686_v43  ;;  %3407 = vmatprep.subr.bf16.mxu0 %v3687_v44  ;;  %v3718_v43 = vld [vmem:[%s4924_s1 + $0x3b8] sm:$0xff]   ;;  %v3719_v44 = vld [vmem:[%s4924_s1 + $0x370] sm:$0xff]  }
  0x46   :  { %3447 = vmatprep.subr.bf16.mxu1 %v3688_v45  ;;  %1618 = vmatprep.mubr.bf16.mxu0 %v2936_v52  ;;  %v3720_v45 = vld [vmem:[%s4924_s1 + $0x3f0] sm:$0xff]   ;;  %v62_v52 = vld [vmem:[%s4925_s0 + $0xe8] sm:$0xff]  ;;  %v40_v34 = vld [vmem:[%s4925_s0 + $0x38] sm:$0xff] }
  0x47   :  { %1683 = vmatprep.mubr.bf16.mxu1 %v2938_v53  ;;  %v2939_v53 = vcombine.low %v53_v48, %v61_v49  ;;  %v72_v48 = vld [vmem:[%s4925_s0 + $0x138] sm:$0xff] }
  0x48   :  { %3408 = vmatpush3.bf16.msra.mxu0 %v3689_v46  ;;  %v3721_v46 = vld [vmem:[%s4924_s1 + $0x330] sm:$0xff]   ;;  %v80_v49 = vld [vmem:[%s4925_s0 + $0x178] sm:$0xff] }
  0x49   :  { %3448 = vmatpush3.bf16.msra.mxu1 %v3690_v47  ;;  %3409 = vmatprep.subr.bf16.mxu0 %v3691_v56  ;;  %v3722_v47 = vld [vmem:[%s4924_s1 + $0x3b0] sm:$0xff]   ;;  %v3723_v56 = vld [vmem:[%s4924_s1 + $0x368] sm:$0xff]  }
  0x4a   :  { %3449 = vmatprep.subr.bf16.mxu1 %v3692_v57  ;;  %v3724_v57 = vld [vmem:[%s4924_s1 + $0x3e8] sm:$0xff]  }
  0x4b   :  { %1619 = vmatmul.mubr.bf16.gmra.mxu0 %v2935_v54  ;;  %v2942_v54 = vcombine.high %v54_v50, %v62_v52 }
  0x4c   :  { %1684 = vmatmul.mubr.bf16.gmra.mxu1 %v2937_v55  ;;  %3410 = vmatpush3.bf16.msra.mxu0 %v3693_v58  ;;  %v2941_v55 = vcombine.low %v54_v50, %v62_v52  ;;  %v3725_v58 = vld [vmem:[%s4924_s1 + $0x328] sm:$0xff]  }
  0x4d   :  { %3450 = vmatpush3.bf16.msra.mxu1 %v3694_v59  ;;  %3411 = vmatprep.subr.bf16.mxu0 %v3695_v60  ;;  %v3726_v59 = vld [vmem:[%s4924_s1 + $0x3a8] sm:$0xff]   ;;  %v3727_v60 = vld [vmem:[%s4924_s1 + $0x360] sm:$0xff]  }
  0x4e   :  { %3451 = vmatprep.subr.bf16.mxu1 %v3696_v61  ;;  %1626 = vmatprep.mubr.bf16.mxu0 %v2952_v3  ;;  %v3728_v61 = vld [vmem:[%s4924_s1 + $0x3e0] sm:$0xff]   ;;  %v70_v3 = vld [vmem:[%s4925_s0 + $0x128] sm:$0xff] }
  0x4f   :  { %1691 = vmatprep.mubr.bf16.mxu1 %v2954_v6  ;;  %v2958_v6 = vcombine.high %v70_v3, %v78_v4 }
  0x50   :  { %3412 = vmatpush3.bf16.msra.mxu0 %v3697_v62  ;;  %v3729_v62 = vld [vmem:[%s4924_s1 + $0x320] sm:$0xff]  }
  0x51   :  { %3452 = vmatpush3.bf16.msra.mxu1 %v3698_v63  ;;  %3413 = vmatprep.subr.bf16.mxu0 %v3699_v8  ;;  %v3730_v63 = vld [vmem:[%s4924_s1 + $0x3a0] sm:$0xff]   ;;  %v3731_v8 = vld [vmem:[%s4924_s1 + $0x358] sm:$0xff]  }
  0x52   :  { %3453 = vmatprep.subr.bf16.mxu1 %v3700_v9  ;;  %v3732_v9 = vld [vmem:[%s4924_s1 + $0x3d8] sm:$0xff]  }
  0x53   :  { %1627 = vmatmul.mubr.bf16.gmra.mxu0 %v2951_v5  ;;  %v2955_v5 = vcombine.low %v69_v0, %v77_v1  ;;  %v3747_v0 = vld [vmem:[%s4926_s3 + $0x70] ss:$8 sps:$4 sm:$0xff]   ;;  %v3749_v1 = vld [vmem:[%s4926_s3 + $0x74] ss:$8 sps:$4 sm:$0xff]  }
  0x54   :  { %1692 = vmatmul.mubr.bf16.gmra.mxu1 %v2953_v7  ;;  %3414 = vmatpush3.bf16.msra.mxu0 %v3701_v10  ;;  %v2957_v7 = vcombine.low %v70_v3, %v78_v4  ;;  %v3733_v10 = vld [vmem:[%s4924_s1 + $0x318] sm:$0xff]   ;;  %v3750_v3 = vld [vmem:[%s4926_s3 + $0x60] ss:$8 sps:$4 sm:$0xff]  }
  0x55   :  { %3454 = vmatpush3.bf16.msra.mxu1 %v3702_v11  ;;  %3415 = vmatprep.subr.bf16.mxu0 %v3703_v12  ;;  %v3734_v11 = vld [vmem:[%s4924_s1 + $0x398] sm:$0xff]   ;;  %v3735_v12 = vld [vmem:[%s4924_s1 + $0x350] sm:$0xff]  }
  0x56   :  { %3455 = vmatprep.subr.bf16.mxu1 %v3704_v13  ;;  %1634 = vmatprep.mubr.bf16.mxu0 %v2968_v18  ;;  %v3736_v13 = vld [vmem:[%s4924_s1 + $0x3d0] sm:$0xff]   ;;  %v86_v18 = vld [vmem:[%s4925_s0 + $0x1a8] sm:$0xff] }
  0x57   :  { %1699 = vmatprep.mubr.bf16.mxu1 %v2970_v22  ;;  %v2971_v22 = vcombine.low %v85_v16, %v93_v17  ;;  %v3755_v4 = vld [vmem:[%s4926_s3 + $0x54] ss:$8 sps:$4 sm:$0xff]   ;;  %v3773_v16 = vld [vmem:[%s4926_s3 + $0x24] ss:$8 sps:$4 sm:$0xff]  }
  0x58   :  { %3416 = vmatpush3.bf16.msra.mxu0 %v3705_v14  ;;  %v3737_v14 = vld [vmem:[%s4924_s1 + $0x310] sm:$0xff]   ;;  %v3776_v17 = vld [vmem:[%s4926_s3 + $0xc4] ss:$8 sps:$4 sm:$0xff]  }
  0x59   :  { %3456 = vmatpush3.bf16.msra.mxu1 %v3706_v15  ;;  %3417 = vmatprep.subr.bf16.mxu0 %v3707_v24  ;;  %v3738_v15 = vld [vmem:[%s4924_s1 + $0x390] sm:$0xff]   ;;  %v3739_v24 = vld [vmem:[%s4924_s1 + $0x348] sm:$0xff]  }
  0x5a   :  { %3457 = vmatprep.subr.bf16.mxu1 %v3708_v25  ;;  %v3740_v25 = vld [vmem:[%s4924_s1 + $0x3c8] sm:$0xff]  }
  0x5b   :  { %1635 = vmatmul.mubr.bf16.gmra.mxu0 %v2967_v21  ;;  %v2974_v21 = vcombine.high %v86_v18, %v94_v19 }
  0x5c   :  { %1700 = vmatmul.mubr.bf16.gmra.mxu1 %v2969_v23  ;;  %3418 = vmatpush3.bf16.msra.mxu0 %v3709_v26  ;;  %v2973_v23 = vcombine.low %v86_v18, %v94_v19  ;;  %v3741_v26 = vld [vmem:[%s4924_s1 + $0x308] sm:$0xff]  }
  0x5d   :  { %3458 = vmatpush3.bf16.msra.mxu1 %v3710_v27  ;;  %3419 = vmatprep.subr.bf16.mxu0 %v3711_v28  ;;  %v3742_v27 = vld [vmem:[%s4924_s1 + $0x388] sm:$0xff]   ;;  %v3743_v28 = vld [vmem:[%s4924_s1 + $0x340] sm:$0xff]  }
  0x5e   :  { %3459 = vmatprep.subr.bf16.mxu1 %v3712_v29  ;;  %1740 = vmatprep.mubr.bf16.mxu0 %v2924_v37  ;;  %v3744_v29 = vld [vmem:[%s4924_s1 + $0x3c0] sm:$0xff]   ;;  %v48_v37 = vld [vmem:[%s4925_s0 + $0x78] sm:$0xff] }
  0x5f   :  { %1805 = vmatprep.mubr.bf16.mxu1 %v2926_v39  ;;  %v63_v39 = vld [vmem:[%s4925_s0 + $0xf0] sm:$0xff]  ;;  %v3771_v18 = vld [vmem:[%s4926_s3 + $0x20] ss:$8 sps:$4 sm:$0xff]  }
  0x60   :  { %3420 = vmatpush3.bf16.msra.mxu0 %v3713_v30  ;;  %v3745_v30 = vld [vmem:[%s4924_s1 + $0x300] sm:$0xff]  }
  0x61   :  { %3460 = vmatpush3.bf16.msra.mxu1 %v3714_v31  ;;  %3485 = vmatprep.subr.bf16.mxu0 %v3715_v40  ;;  %v3746_v31 = vld [vmem:[%s4924_s1 + $0x380] sm:$0xff]   ;;  %v2929_v40 = vcombine.low %v40_v34, %v48_v37 }
  0x62   :  { %3525 = vmatprep.subr.bf16.mxu1 %v3716_v41  ;;  %v2930_v41 = vcombine.high %v40_v34, %v48_v37  ;;  %v3774_v19 = vld [vmem:[%s4926_s3 + $0xc0] ss:$8 sps:$4 sm:$0xff]  }
  0x63   :  { %1741 = vmatmul.mubr.bf16.vlgmr.msra.gmra.mxu0 %v2923_v36  ;;  %v2928_v36 = vcombine.high %v39_v32, %v47_v33  ;;  %v3867_v33 = vmov 0   ;;  %v4593_v34 = vld [vmem:[%s4927_s2] ss:$0 sm:$0xff] }
  0x64   :  { %1806 = vmatmul.mubr.bf16.vlgmr.msra.gmra.mxu1 %v2925_v38  ;;  %3486 = vmatpush3.bf16.msra.mxu0 %v3717_v42  ;;  %v55_v38 = vld [vmem:[%s4925_s0 + $0xb0] sm:$0xff] }
  0x65   :  { %3526 = vmatpush3.bf16.msra.mxu1 %v3718_v43  ;;  %3487 = vmatprep.subr.bf16.mxu0 %v3719_v44  ;;  %v2944_v42 = vcombine.high %v55_v38, %v63_v39  ;;  %v56_v43 = vld [vmem:[%s4925_s0 + $0xb8] sm:$0xff]  ;;  %v2943_v50 = vcombine.low %v55_v38, %v63_v39  ;;  %v3797_v38 = vld [vmem:[%s4926_s3 + $0x84] ss:$8 sps:$4 sm:$0xff]  }
  0x66   :  { %3527 = vmatprep.subr.bf16.mxu1 %v3720_v45  ;;  %1748 = vmatprep.mubr.bf16.mxu0 %v2940_v51  ;;  %v64_v44 = vld [vmem:[%s4925_s0 + $0xf8] sm:$0xff] }
  0x67   :  { %1813 = vmatprep.mubr.bf16.mxu1 %v2942_v54  ;;  %v2946_v45 = vcombine.high %v56_v43, %v64_v44  ;;  %v2945_v51 = vcombine.low %v56_v43, %v64_v44  ;;  %v87_v54 = vld [vmem:[%s4925_s0 + $0x1b0] sm:$0xff] }
  0x68   :  { %3488 = vmatpush3.bf16.msra.mxu0 %v3721_v46  ;;  %v71_v46 = vld [vmem:[%s4925_s0 + $0x130] sm:$0xff] }
  0x69   :  { %3528 = vmatpush3.bf16.msra.mxu1 %v3722_v47  ;;  %3489 = vmatprep.subr.bf16.mxu0 %v3723_v56  ;;  %v79_v47 = vld [vmem:[%s4925_s0 + $0x170] sm:$0xff]  ;;  %v88_v56 = vld [vmem:[%s4925_s0 + $0x1b8] sm:$0xff] }
  0x6a   :  { %3529 = vmatprep.subr.bf16.mxu1 %v3724_v57  ;;  %v2960_v52 = vcombine.high %v71_v46, %v79_v47  ;;  %v96_v57 = vld [vmem:[%s4925_s0 + $0x1f8] sm:$0xff] }
  0x6b   :  { %1749 = vmatmul.mubr.bf16.gmra.mxu0 %v2939_v53  ;;  %v2962_v53 = vcombine.high %v72_v48, %v80_v49 }
  0x6c   :  { %1814 = vmatmul.mubr.bf16.gmra.mxu1 %v2941_v55  ;;  %3490 = vmatpush3.bf16.msra.mxu0 %v3725_v58  ;;  %v95_v55 = vld [vmem:[%s4925_s0 + $0x1f0] sm:$0xff]  ;;  %v2959_v58 = vcombine.low %v71_v46, %v79_v47 }
  0x6d   :  { %3530 = vmatpush3.bf16.msra.mxu1 %v3726_v59  ;;  %3491 = vmatprep.subr.bf16.mxu0 %v3727_v60  ;;  %v2961_v59 = vcombine.low %v72_v48, %v80_v49  ;;  %v2976_v60 = vcombine.high %v87_v54, %v95_v55  ;;  %v3806_v48 = vld [vmem:[%s4926_s3 + $0x1f4] ss:$8 sps:$4 sm:$0xff]  }
  0x6e   :  { %3531 = vmatprep.subr.bf16.mxu1 %v3728_v61  ;;  %1756 = vmatprep.mubr.bf16.mxu0 %v2956_v2  ;;  %v2978_v61 = vcombine.high %v88_v56, %v96_v57  ;;  %v3752_v2 = vld [vmem:[%s4926_s3 + $0x64] ss:$8 sps:$4 sm:$0xff]  }
  0x6f   :  { %1821 = vmatprep.mubr.bf16.mxu1 %v2958_v6  ;;  %v3753_v6 = vld [vmem:[%s4926_s3 + $0x50] ss:$8 sps:$4 sm:$0xff]  }
  0x70   :  { %3492 = vmatpush3.bf16.msra.mxu0 %v3729_v62  ;;  %v2975_v62 = vcombine.low %v87_v54, %v95_v55 }
  0x71   :  { %3532 = vmatpush3.bf16.msra.mxu1 %v3730_v63  ;;  %3493 = vmatprep.subr.bf16.mxu0 %v3731_v8  ;;  %v2977_v63 = vcombine.low %v88_v56, %v96_v57  ;;  %v3761_v8 = vld [vmem:[%s4926_s3 + $0x44] ss:$8 sps:$4 sm:$0xff]  }
  0x72   :  { %3533 = vmatprep.subr.bf16.mxu1 %v3732_v9  ;;  %v3764_v9 = vld [vmem:[%s4926_s3 + $0xe4] ss:$8 sps:$4 sm:$0xff]  }
  0x73   :  { %1757 = vmatmul.mubr.bf16.gmra.mxu0 %v2955_v5  ;;  %v3758_v5 = vld [vmem:[%s4926_s3 + $0xf4] ss:$8 sps:$4 sm:$0xff]  }
  0x74   :  { %1822 = vmatmul.mubr.bf16.gmra.mxu1 %v2957_v7  ;;  %3494 = vmatpush3.bf16.msra.mxu0 %v3733_v10  ;;  %v3756_v7 = vld [vmem:[%s4926_s3 + $0xf0] ss:$8 sps:$4 sm:$0xff]   ;;  %v3759_v10 = vld [vmem:[%s4926_s3 + $0x40] ss:$8 sps:$4 sm:$0xff]  }
  0x75   :  { %3534 = vmatpush3.bf16.msra.mxu1 %v3734_v11  ;;  %3495 = vmatprep.subr.bf16.mxu0 %v3735_v12  ;;  %v3762_v11 = vld [vmem:[%s4926_s3 + $0xe0] ss:$8 sps:$4 sm:$0xff]   ;;  %v3767_v12 = vld [vmem:[%s4926_s3 + $0x34] ss:$8 sps:$4 sm:$0xff]  }
  0x76   :  { %3535 = vmatprep.subr.bf16.mxu1 %v3736_v13  ;;  %1764 = vmatprep.mubr.bf16.mxu0 %v2972_v20  ;;  %v3770_v13 = vld [vmem:[%s4926_s3 + $0xd4] ss:$8 sps:$4 sm:$0xff]  }
  0x77   :  { %1829 = vmatprep.mubr.bf16.mxu1 %v2974_v21  ;;  %v3779_v20 = vld [vmem:[%s4926_s3 + $0x14] ss:$8 sps:$4 sm:$0xff]  }
  0x78   :  { %3496 = vmatpush3.bf16.msra.mxu0 %v3737_v14  ;;  %v3765_v14 = vld [vmem:[%s4926_s3 + $0x30] ss:$8 sps:$4 sm:$0xff]   ;;  %v3782_v21 = vld [vmem:[%s4926_s3 + $0xb4] ss:$8 sps:$4 sm:$0xff]  }
  0x79   :  { %3536 = vmatpush3.bf16.msra.mxu1 %v3738_v15  ;;  %3497 = vmatprep.subr.bf16.mxu0 %v3739_v24  ;;  %v3768_v15 = vld [vmem:[%s4926_s3 + $0xd0] ss:$8 sps:$4 sm:$0xff]   ;;  %v3785_v24 = vld [vmem:[%s4926_s3 + $0x4] ss:$8 sps:$4 sm:$0xff]  }
  0x7a   :  { %3537 = vmatprep.subr.bf16.mxu1 %v3740_v25  ;;  %v3788_v25 = vld [vmem:[%s4926_s3 + $0xa4] ss:$8 sps:$4 sm:$0xff]  }
  0x7b   :  { %1765 = vmatmul.mubr.bf16.gmra.mxu0 %v2971_v22  ;;  %v3777_v22 = vld [vmem:[%s4926_s3 + $0x10] ss:$8 sps:$4 sm:$0xff]  }
  0x7c   :  { %1830 = vmatmul.mubr.bf16.gmra.mxu1 %v2973_v23  ;;  %3498 = vmatpush3.bf16.msra.mxu0 %v3741_v26  ;;  %v3780_v23 = vld [vmem:[%s4926_s3 + $0xb0] ss:$8 sps:$4 sm:$0xff]   ;;  %v3783_v26 = vld [vmem:[%s4926_s3] ss:$8 sps:$4 sm:$0xff]  }
  0x7d   :  { %3538 = vmatpush3.bf16.msra.mxu1 %v3742_v27  ;;  %3499 = vmatprep.subr.bf16.mxu0 %v3743_v28  ;;  %v3786_v27 = vld [vmem:[%s4926_s3 + $0xa0] ss:$8 sps:$4 sm:$0xff]   ;;  %v3791_v28 = vld [vmem:[%s4926_s3 + $0x94] ss:$8 sps:$4 sm:$0xff]  }
  0x7e   :  { %3539 = vmatprep.subr.bf16.mxu1 %v3744_v29  ;;  %1870 = vmatprep.mubr.bf16.mxu0 %v2928_v36  ;;  %v3794_v29 = vld [vmem:[%s4926_s3 + $0x174] ss:$8 sps:$4 sm:$0xff]  }
  0x7f   :  { %1935 = vmatprep.mubr.bf16.mxu1 %v2930_v41  ;;  %v3795_v41 = vld [vmem:[%s4926_s3 + $0x80] ss:$8 sps:$4 sm:$0xff]  }
  0x80   :  { %3500 = vmatpush3.bf16.msra.mxu0 %v3745_v30 }
  0x81   :  { %3540 = vmatpush3.bf16.msra.mxu1 %v3746_v31  ;;  %2084 = vmatprep.subr.bf16.mxu0 %v3749_v1  ;;  %v3789_v31 = vld [vmem:[%s4926_s3 + $0x90] ss:$8 sps:$4 sm:$0xff]  }
  0x82   :  { %2236 = vmatprep.subr.bf16.mxu1 %v3758_v5 }
  0x83   :  { %1871 = vmatmul.mubr.bf16.vlgmr.msra.gmra.mxu0 %v2927_v35 }
  0x84   :  { %1936 = vmatmul.mubr.bf16.vlgmr.msra.gmra.mxu1 %v2929_v40  ;;  %1878 = vmatprep.mubr.bf16.mxu0 %v2944_v42 }
  0x85   :  { %1943 = vmatprep.mubr.bf16.mxu1 %v2946_v45  ;;  %2085 = vmatpush1.bf16.msra.mxu0 %v3747_v0 }
  0x86   :  { %2086 = vmatprep.subr.bf16.mxu0 %v3752_v2  ;;  %2237 = vmatpush1.bf16.msra.mxu1 %v3756_v7 }
  0x87   :  { %2238 = vmatprep.subr.bf16.mxu1 %v3764_v9 }
  0x89   :  { %2087 = vmatpush1.bf16.msra.mxu0 %v3750_v3 }
  0x8a   :  { %2088 = vmatprep.subr.bf16.mxu0 %v3755_v4  ;;  %2239 = vmatpush1.bf16.msra.mxu1 %v3762_v11 }
  0x8b   :  { %1879 = vmatmul.mubr.bf16.gmra.mxu0 %v2943_v50  ;;  %2240 = vmatprep.subr.bf16.mxu1 %v3770_v13 }
  0x8c   :  { %1944 = vmatmul.mubr.bf16.gmra.mxu1 %v2945_v51  ;;  %1886 = vmatprep.mubr.bf16.mxu0 %v2960_v52 }
  0x8d   :  { %1951 = vmatprep.mubr.bf16.mxu1 %v2962_v53  ;;  %2089 = vmatpush1.bf16.msra.mxu0 %v3753_v6 }
  0x8e   :  { %2090 = vmatprep.subr.bf16.mxu0 %v3761_v8  ;;  %2241 = vmatpush1.bf16.msra.mxu1 %v3768_v15 }
  0x8f   :  { %2242 = vmatprep.subr.bf16.mxu1 %v3776_v17 }
  0x91   :  { %2091 = vmatpush1.bf16.msra.mxu0 %v3759_v10 }
  0x92   :  { %2092 = vmatprep.subr.bf16.mxu0 %v3767_v12  ;;  %2243 = vmatpush1.bf16.msra.mxu1 %v3774_v19 }
  0x93   :  { %1887 = vmatmul.mubr.bf16.gmra.mxu0 %v2959_v58  ;;  %2244 = vmatprep.subr.bf16.mxu1 %v3782_v21 }
  0x94   :  { %1952 = vmatmul.mubr.bf16.gmra.mxu1 %v2961_v59  ;;  %1894 = vmatprep.mubr.bf16.mxu0 %v2976_v60 }
  0x95   :  { %1959 = vmatprep.mubr.bf16.mxu1 %v2978_v61  ;;  %2093 = vmatpush1.bf16.msra.mxu0 %v3765_v14 }
  0x96   :  { %2094 = vmatprep.subr.bf16.mxu0 %v3773_v16  ;;  %2245 = vmatpush1.bf16.msra.mxu1 %v3780_v23 }
  0x97   :  { %2246 = vmatprep.subr.bf16.mxu1 %v3788_v25 }
  0x99   :  { %2095 = vmatpush1.bf16.msra.mxu0 %v3771_v18 }
  0x9a   :  { %2096 = vmatprep.subr.bf16.mxu0 %v3779_v20  ;;  %2247 = vmatpush1.bf16.msra.mxu1 %v3786_v27 }
  0x9b   :  { %1895 = vmatmul.mubr.bf16.gmra.mxu0 %v2975_v62  ;;  %2248 = vmatprep.subr.bf16.mxu1 %v3791_v28 }
  0x9c   :  { %1960 = vmatmul.mubr.bf16.gmra.mxu1 %v2977_v63  ;;  %2116 = vmatprep.mubr.bf16.mxu0 %v3867_v33 }
  0x9d   :  { %2097 = vmatpush1.bf16.msra.mxu0 %v3777_v22  ;;  %2268 = vmatprep.mubr.bf16.mxu1 %v3867_v33 }
  0x9e   :  { %2098 = vmatprep.subr.bf16.mxu0 %v3785_v24  ;;  %2249 = vmatpush1.bf16.msra.mxu1 %v3789_v31 }
  0x9f   :  { %2250 = vmatprep.subr.bf16.mxu1 %v3797_v38 }
  0xa1   :  { %2099 = vmatpush1.bf16.msra.mxu0 %v3783_v26 }
  0xa2   :  { %2388 = vmatprep.subr.bf16.mxu0 %v3794_v29  ;;  %2251 = vmatpush1.bf16.msra.mxu1 %v3795_v41 }
  0xa3   :  { %2540 = vmatprep.subr.bf16.mxu1 %v3806_v48 }
  0xe3   :  { %v3261_v30 = vpop.f32.mrf.mxu0 }
  0xe4   :  { %v3301_v32 = vpop.f32.mrf.mxu1 }
  0xe5   :  { %v3262_v35 = vpop.f32.mrf.mxu0 }
  0xe6   :  { %v3263_v36 = vadd.f32 %v3262_v35, %v3261_v30  ;;  %v3302_v37 = vpop.f32.mrf.mxu1 }
  0xe7   :  { %v3303_v39 = vadd.f32 %v3302_v37, %v3301_v32  ;;  %v3264_v40 = vpop.f32.mrf.mxu0 }
  0xe8   :  { %v1483_v42 = vadd.f32 %v3263_v36, %v4593_v34  ;;  %v3304_v43 = vpop.f32.mrf.mxu1 }
  0xe9   :  { %v3265_v44 = vpop.f32.mrf.mxu0 }
  0xea   :  { %v4603_v45 = vadd.f32 %v3303_v39, %v1483_v42  ;;  %v3266_v46 = vadd.f32 %v3265_v44, %v3264_v40  ;;  %v3305_v47 = vpop.f32.mrf.mxu1 }
  0xeb   :  { %v3306_v49 = vadd.f32 %v3305_v47, %v3304_v43  ;;  %v3267_v51 = vpop.f32.mrf.mxu0 }
  0xec   :  { %v1486_v50 = vadd.f32 %v3266_v46, %v4593_v34  ;;  %v3307_v52 = vpop.f32.mrf.mxu1 }
  0xed   :  { %v3268_v54 = vpop.f32.mrf.mxu0 }
  0xee   :  { %v4609_v53 = vadd.f32 %v3306_v49, %v1486_v50  ;;  %v3269_v55 = vadd.f32 %v3268_v54, %v3267_v51  ;;  %v3308_v56 = vpop.f32.mrf.mxu1 }
  0xef   :  { %v3309_v57 = vadd.f32 %v3308_v56, %v3307_v52  ;;  %v3270_v58 = vpop.f32.mrf.mxu0 }
  0xf0   :  { %v1491_v59 = vadd.f32 %v3269_v55, %v4593_v34  ;;  %v3310_v60 = vpop.f32.mrf.mxu1 }
  0xf1   :  { %v3271_v61 = vpop.f32.mrf.mxu0 }
  0xf2   :  { %v4612_v62 = vadd.f32 %v3309_v57, %v1491_v59  ;;  %v3272_v63 = vadd.f32 %v3271_v61, %v3270_v58  ;;  %v3311_v0 = vpop.f32.mrf.mxu1 }
  0xf3   :  { %v3312_v1 = vadd.f32 %v3311_v0, %v3310_v60  ;;  %v3273_v3 = vpop.f32.mrf.mxu0 }
  0xf4   :  { %v1494_v2 = vadd.f32 %v3272_v63, %v4593_v34  ;;  %v3313_v4 = vpop.f32.mrf.mxu1 }
  0xf5   :  { %v3274_v6 = vpop.f32.mrf.mxu0 }
  0xf6   :  { %v4615_v5 = vadd.f32 %v3312_v1, %v1494_v2  ;;  %v3314_v7 = vpop.f32.mrf.mxu1  ;;  %v3275_v8 = vadd.f32 %v3274_v6, %v3273_v3 }
  0xf7   :  { %v3315_v9 = vadd.f32 %v3314_v7, %v3313_v4  ;;  %v3276_v10 = vpop.f32.mrf.mxu0 }
  0xf8   :  { %v3316_v11 = vpop.f32.mrf.mxu1  ;;  %v1499_v12 = vadd.f32 %v3275_v8, %v4593_v34 }
  0xf9   :  { %v3277_v13 = vpop.f32.mrf.mxu0 }
  0xfa   :  { %v3317_v14 = vpop.f32.mrf.mxu1  ;;  %v1564_v15 = vadd.f32 %v3315_v9, %v1499_v12  ;;  %v3278_v16 = vadd.f32 %v3277_v13, %v3276_v10 }
  0xfb   :  { %v3318_v17 = vadd.f32 %v3317_v14, %v3316_v11  ;;  %v3279_v19 = vpop.f32.mrf.mxu0 }
  0xfc   :  { %v1502_v18 = vadd.f32 %v3278_v16, %v4593_v34  ;;  %v3319_v20 = vpop.f32.mrf.mxu1 }
  0xfd   :  { %v3280_v22 = vpop.f32.mrf.mxu0 }
  0xfe   :  { %v1567_v21 = vadd.f32 %v3318_v17, %v1502_v18  ;;  %v3281_v23 = vadd.f32 %v3280_v22, %v3279_v19  ;;  %v3320_v24 = vpop.f32.mrf.mxu1 }
  0xff   :  { %v3321_v25 = vadd.f32 %v3320_v24, %v3319_v20  ;;  %v3282_v26 = vpop.f32.mrf.mxu0 }
 0x100   :  { %v1507_v27 = vadd.f32 %v3281_v23, %v4593_v34  ;;  %v3322_v28 = vpop.f32.mrf.mxu1 }
 0x101   :  { %v3283_v29 = vpop.f32.mrf.mxu0 }
 0x102   :  { %v1572_v30 = vadd.f32 %v3321_v25, %v1507_v27  ;;  %v3284_v31 = vadd.f32 %v3283_v29, %v3282_v26  ;;  %v3323_v32 = vpop.f32.mrf.mxu1 }
 0x103   :  { %v3324_v35 = vadd.f32 %v3323_v32, %v3322_v28  ;;  %v4621_v37 = vpop.f32.mrf.mxu0 }
 0x104   :  { %v1510_v36 = vadd.f32 %v3284_v31, %v4593_v34  ;;  %v4623_v38 = vpop.f32.mrf.mxu1 }
 0x105   :  { %v4625_v40 = vpop.f32.mrf.mxu0 }
 0x106   :  { %v1575_v39 = vadd.f32 %v3324_v35, %v1510_v36  ;;  %v4627_v41 = vpop.f32.mrf.mxu1 }
 0x107   :  { %v4629_v42 = vpop.f32.mrf.mxu0 }
 0x108   :  { %v4631_v43 = vpop.f32.mrf.mxu1 }
 0x109   :  { %v4633_v44 = vpop.f32.mrf.mxu0 }
 0x10a   :  { %v4635_v46 = vpop.f32.mrf.mxu1 }
 0x10b   :  { %v4637_v47 = vpop.f32.mrf.mxu0 }
 0x10c   :  { %v4639_v34 = vpop.f32.mrf.mxu1 }
 0x10d   :  { %v4641_v48 = vpop.f32.mrf.mxu0 }
 0x10e   :  { %v4643_v49 = vpop.f32.mrf.mxu1 }
 0x10f   :  { %v4645_v50 = vpop.f32.mrf.mxu0 }
 0x110   :  { %v4647_v51 = vpop.f32.mrf.mxu1 }
 0x111   :  { %v4649_v52 = vpop.f32.mrf.mxu0 }
 0x112   :  { %v4651_v54 = vpop.f32.mrf.mxu1 }
 0x113   :  { %v3353_v55 = vpop.f32.mrf.mxu0 }
 0x114   :  { %v3393_v56 = vpop.f32.mrf.mxu1 }
 0x115   :  { %v3354_v57 = vpop.f32.mrf.mxu0 }
 0x116   :  { %v3355_v58 = vadd.f32 %v3354_v57, %v3353_v55  ;;  %v3394_v59 = vpop.f32.mrf.mxu1 }
 0x117   :  { %v3395_v60 = vadd.f32 %v3394_v59, %v3393_v56  ;;  %v3356_v61 = vpop.f32.mrf.mxu0 }
 0x118   :  { %v1629_v63 = vadd.f32 %v3355_v58, %v1564_v15  ;;  %v3396_v0 = vpop.f32.mrf.mxu1 }
 0x119   :  { %v3357_v1 = vpop.f32.mrf.mxu0 }
 0x11a   :  { %v4653_v2 = vadd.f32 %v3395_v60, %v1629_v63  ;;  %v3358_v3 = vadd.f32 %v3357_v1, %v3356_v61  ;;  %v3397_v4 = vpop.f32.mrf.mxu1 }
 0x11b   :  { %v3398_v6 = vadd.f32 %v3397_v4, %v3396_v0  ;;  %v3359_v8 = vpop.f32.mrf.mxu0 }
 0x11c   :  { %v1632_v7 = vadd.f32 %v3358_v3, %v1567_v21  ;;  %v3399_v9 = vpop.f32.mrf.mxu1 }
 0x11d   :  { %v3360_v11 = vpop.f32.mrf.mxu0 }
 0x11e   :  { %v4655_v10 = vadd.f32 %v3398_v6, %v1632_v7  ;;  %v3361_v12 = vadd.f32 %v3360_v11, %v3359_v8  ;;  %v3400_v13 = vpop.f32.mrf.mxu1  ;;  %v3343_v7 = vadd.f32 %v4625_v40, %v4621_v37 }
 0x11f   :  { %v3401_v14 = vadd.f32 %v3400_v13, %v3399_v9  ;;  %v3362_v16 = vpop.f32.mrf.mxu0 }
 0x120   :  { %v1637_v17 = vadd.f32 %v3361_v12, %v1572_v30  ;;  %v3402_v18 = vpop.f32.mrf.mxu1  ;;  %v1613_v11 = vadd.f32 %v3343_v7, %v4603_v45  ;;  %v3346_v12 = vadd.f32 %v4633_v44, %v4629_v42  ;;  %v3349_v45 = vadd.f32 %v4641_v48, %v4637_v47 }
 0x121   :  { %v3363_v15 = vpop.f32.mrf.mxu0  ;;  %v3386_v44 = vadd.f32 %v4635_v46, %v4631_v43  ;;  %v3389_v47 = vadd.f32 %v4643_v49, %v4639_v34 }
 0x122   :  { %v4657_v19 = vadd.f32 %v3401_v14, %v1637_v17  ;;  %v3364_v20 = vadd.f32 %v3363_v15, %v3362_v16  ;;  %v3403_v22 = vpop.f32.mrf.mxu1  ;;  %v3383_v16 = vadd.f32 %v4627_v41, %v4623_v38  ;;  %v1616_v15 = vadd.f32 %v3346_v12, %v4609_v53 }
 0x123   :  { %v3404_v23 = vadd.f32 %v3403_v22, %v3402_v18  ;;  %v3421_v25 = vpop.f32.mrf.mxu0  ;;  %v3352_v41 = vadd.f32 %v4649_v52, %v4645_v50 }
 0x124   :  { %v1640_v24 = vadd.f32 %v3364_v20, %v1575_v39  ;;  %v3461_v21 = vpop.f32.mrf.mxu1  ;;  %v1678_v40 = vadd.f32 %v3383_v16, %v1613_v11 }
 0x125   :  { %v3422_v27 = vpop.f32.mrf.mxu0  ;;  %v1624_v46 = vadd.f32 %v3352_v41, %v4615_v5 }
 0x126   :  { %v4659_v26 = vadd.f32 %v3404_v23, %v1640_v24  ;;  %v3462_v28 = vpop.f32.mrf.mxu1  ;;  %v3423_v17 = vadd.f32 %v3422_v27, %v3421_v25  ;;  %v1681_v24 = vadd.f32 %v3386_v44, %v1616_v15  ;;  %v1621_v25 = vadd.f32 %v3349_v45, %v4612_v62 }
 0x127   :  { %v3424_v29 = vpop.f32.mrf.mxu0  ;;  %v3463_v53 = vadd.f32 %v3462_v28, %v3461_v21  ;;  %v3392_v62 = vadd.f32 %v4651_v54, %v4647_v51 }
 0x128   :  { %v3464_v31 = vpop.f32.mrf.mxu1  ;;  %v1743_v22 = vadd.f32 %v3423_v17, %v1678_v40 }
 0x129   :  { %v3425_v32 = vpop.f32.mrf.mxu0 }
 0x12a   :  { %v3465_v35 = vpop.f32.mrf.mxu1  ;;  %v3426_v38 = vadd.f32 %v3425_v32, %v3424_v29  ;;  %v1808_v7 = vadd.f32 %v3463_v53, %v1743_v22  ;;  %v1686_v32 = vadd.f32 %v3389_v47, %v1621_v25 }
 0x12b   :  { %v3427_v36 = vpop.f32.mrf.mxu0  ;;  %v3466_v50 = vadd.f32 %v3465_v35, %v3464_v31 }
 0x12c   :  { %v4661_v30 = vpop.f32.mrf.mxu1  ;;  %v1746_v11 = vadd.f32 %v3426_v38, %v1681_v24 }
 0x12d   :  { %v3428_v55 = vpop.f32.mrf.mxu0 }
 0x12e   :  { %v3468_v56 = vpop.f32.mrf.mxu1  ;;  %v3429_v12 = vadd.f32 %v3428_v55, %v3427_v36  ;;  %v1811_v40 = vadd.f32 %v3466_v50, %v1746_v11  ;;  %v1689_v36 = vadd.f32 %v3392_v62, %v1624_v46 }
 0x12f   :  { %v3430_v57 = vpop.f32.mrf.mxu0  ;;  %v3469_v44 = vadd.f32 %v3468_v56, %v4661_v30 }
 0x130   :  { %v4663_v58 = vpop.f32.mrf.mxu1  ;;  %v1751_v34 = vadd.f32 %v3429_v12, %v1686_v32 }
 0x131   :  { %v3431_v59 = vpop.f32.mrf.mxu0 }
 0x132   :  { %v4665_v39 = vpop.f32.mrf.mxu1  ;;  %v3432_v21 = vadd.f32 %v3431_v59, %v3430_v57  ;;  %v1816_v24 = vadd.f32 %v3469_v44, %v1751_v34  ;;  %v3804_v44 = vld [vmem:[%s4926_s3 + $0x1f0] ss:$8 sps:$4 sm:$0xff]  }
 0x133   :  { %v3433_v60 = vpop.f32.mrf.mxu0  ;;  %v3472_v59 = vadd.f32 %v4665_v39, %v4663_v58  ;;  %v3800_v39 = vld [vmem:[%s4926_s3 + $0x164] ss:$8 sps:$4 sm:$0xff]  }
 0x134   :  { %v4667_v61 = vpop.f32.mrf.mxu1  ;;  %v1754_v35 = vadd.f32 %v3432_v21, %v1689_v36 }
 0x135   :  { %v3434_v63 = vpop.f32.mrf.mxu0 }
 0x136   :  { %v4669_v0 = vpop.f32.mrf.mxu1  ;;  %v3435_v41 = vadd.f32 %v3434_v63, %v3433_v60  ;;  %v1819_v30 = vadd.f32 %v3472_v59, %v1754_v35  ;;  %v3792_v60 = vld [vmem:[%s4926_s3 + $0x170] ss:$8 sps:$4 sm:$0xff]   ;;  %v3810_v59 = vld [vmem:[%s4926_s3 + $0x1e0] ss:$8 sps:$4 sm:$0xff]  }
 0x137   :  { %v4671_v1 = vpop.f32.mrf.mxu0 }
 0x138   :  { %v4673_v3 = vpop.f32.mrf.mxu1  ;;  %v1759_v56 = vadd.f32 %v3435_v41, %v4653_v2  ;;  %v3475_v2 = vadd.f32 %v4669_v0, %v4667_v61 }
 0x139   :  { %v4675_v4 = vpop.f32.mrf.mxu0 }
 0x13a   :  { %v4677_v6 = vpop.f32.mrf.mxu1  ;;  %v3438_v63 = vadd.f32 %v4675_v4, %v4671_v1 }
 0x13b   :  { %v4681_v8 = vpop.f32.mrf.mxu0 }
 0x13c   :  { %v4683_v9 = vpop.f32.mrf.mxu1  ;;  %v1762_v62 = vadd.f32 %v3438_v63, %v4655_v10 }
 0x13d   :  { %v4688_v13 = vpop.f32.mrf.mxu0 }
 0x13e   :  { %v4690_v14 = vpop.f32.mrf.mxu1  ;;  %v3441_v1 = vadd.f32 %v4688_v13, %v4681_v8  ;;  %v3478_v8 = vadd.f32 %v4677_v6, %v4673_v3 }
 0x13f   :  { %v4694_v18 = vpop.f32.mrf.mxu0  ;;  %v3481_v35 = vadd.f32 %v4690_v14, %v4683_v9 }
 0x140   :  { %v4696_v37 = vpop.f32.mrf.mxu1  ;;  %v1767_v36 = vadd.f32 %v3441_v1, %v4657_v19  ;;  %v3809_v19 = vld [vmem:[%s4926_s3 + $0x144] ss:$8 sps:$4 sm:$0xff]  }
 0x141   :  { %v4701_v20 = vpop.f32.mrf.mxu0 }
 0x142   :  { %v4703_v42 = vpop.f32.mrf.mxu1  ;;  %v3444_v3 = vadd.f32 %v4701_v20, %v4694_v18  ;;  %v1832_v20 = vadd.f32 %v3481_v35, %v1767_v36  ;;  %v3843_v36 = vld [vmem:[%s4928_s5 + $0x78] sm:$0xff]   ;;  %v3854_v35 = vld [vmem:[%s4928_s5 + $0x10] sm:$0xff]  }
 0x143   :  { %v3501_v23 = vpop.f32.mrf.mxu0 }
 0x144   :  { %v3541_v27 = vpop.f32.mrf.mxu1  ;;  %v1770_v9 = vadd.f32 %v3444_v3, %v4659_v26  ;;  %v3848_v3 = vld [vmem:[%s4928_s5 + $0x28] sm:$0xff]  }
 0x145   :  { %v3502_v48 = vpop.f32.mrf.mxu0 }
 0x146   :  { %v3503_v16 = vadd.f32 %v3502_v48, %v3501_v23  ;;  %v3542_v43 = vpop.f32.mrf.mxu1 }
 0x147   :  { %v3504_v29 = vpop.f32.mrf.mxu0  ;;  %v3543_v49 = vadd.f32 %v3542_v43, %v3541_v27 }
 0x148   :  { %v1873_v52 = vadd.f32 %v3503_v16, %v1808_v7  ;;  %v3544_v17 = vpop.f32.mrf.mxu1 }
 0x149   :  { %v3505_v28 = vpop.f32.mrf.mxu0 }
 0x14a   :  { %v3506_v15 = vadd.f32 %v3505_v28, %v3504_v29  ;;  %v3545_v45 = vpop.f32.mrf.mxu1  ;;  %v1938_v5 = vadd.f32 %v3543_v49, %v1873_v52  ;;  %v3798_v52 = vld [vmem:[%s4926_s3 + $0x160] ss:$8 sps:$4 sm:$0xff]   ;;  %v3803_v28 = vld [vmem:[%s4926_s3 + $0x154] ss:$8 sps:$4 sm:$0xff]  }
 0x14b   :  { %v3507_v55 = vpop.f32.mrf.mxu0  ;;  %v3546_v38 = vadd.f32 %v3545_v45, %v3544_v17  ;;  %v1824_v17 = vadd.f32 %v3475_v2, %v1759_v56 }
 0x14c   :  { %v1876_v22 = vadd.f32 %v3506_v15, %v1811_v40  ;;  %v3547_v31 = vpop.f32.mrf.mxu1  ;;  %v1968_v53 = vmax.f32 %v1938_v5, 0.0  ;;  %v1827_v5 = vadd.f32 %v3478_v8, %v1762_v62  ;;  %v3836_v8 = vld [vmem:[%s4926_s3 + $0x1a4] ss:$8 sps:$4 sm:$0xff]  }
 0x14d   :  { %v3508_v23 = vpop.f32.mrf.mxu0 }
 0x14e   :  { %v1941_v51 = vadd.f32 %v3546_v38, %v1876_v22  ;;  %v3509_v54 = vadd.f32 %v3508_v23, %v3507_v55  ;;  %v3548_v57 = vpop.f32.mrf.mxu1  ;;  %v3801_v55 = vld [vmem:[%s4926_s3 + $0x150] ss:$8 sps:$4 sm:$0xff]  }
 0x14f   :  { %v3510_v25 = vpop.f32.mrf.mxu0  ;;  %v3549_v12 = vadd.f32 %v3548_v57, %v3547_v31  ;;  %v3812_v31 = vld [vmem:[%s4926_s3 + $0x1e4] ss:$8 sps:$4 sm:$0xff]   ;;  %v3807_v57 = vld [vmem:[%s4926_s3 + $0x140] ss:$8 sps:$4 sm:$0xff]  }
 0x150   :  { %v1969_v27 = vmax.f32 %v1941_v51, 0.0  ;;  %v1881_v47 = vadd.f32 %v3509_v54, %v1816_v24  ;;  %v3550_v48 = vpop.f32.mrf.mxu1 }
 0x151   :  { %v3511_v7 = vpop.f32.mrf.mxu0 }
 0x152   :  { %v1976_v11 = vpack.c.bf16 %v1969_v27, %v1968_v53  ;;  %v3512_v16 = vadd.f32 %v3511_v7, %v3510_v25  ;;  %v3551_v58 = vpop.f32.mrf.mxu1  ;;  %v1946_v46 = vadd.f32 %v3549_v12, %v1881_v47  ;;  %v3815_v27 = vld [vmem:[%s4926_s3 + $0x134] ss:$8 sps:$4 sm:$0xff]   ;;  %v3813_v12 = vld [vmem:[%s4926_s3 + $0x130] ss:$8 sps:$4 sm:$0xff]  }
 0x153   :  { %v3513_v43 = vpop.f32.mrf.mxu0  ;;  %v3552_v32 = vadd.f32 %v3551_v58, %v3550_v48  ;;  %v3818_v47 = vld [vmem:[%s4926_s3 + $0x1d4] ss:$8 sps:$4 sm:$0xff]   ;;  %v3484_v48 = vadd.f32 %v4703_v42, %v4696_v37 }
 0x154   :  { %v1884_v29 = vadd.f32 %v3512_v16, %v1819_v30  ;;  %2117 = vmatmul.mubr.bf16.vlgmr.msra.gmra.mxu0 %v1976_v11  ;;  %v3553_v50 = vpop.f32.mrf.mxu1  ;;  %v1970_v40 = vmax.f32 %v1946_v46, 0.0  ;;  %v3816_v16 = vld [vmem:[%s4926_s3 + $0x1d0] ss:$8 sps:$4 sm:$0xff]  }
 0x155   :  { %2389 = vmatpush1.bf16.msra.mxu0 %v3792_v60  ;;  %v3514_v4 = vpop.f32.mrf.mxu0  ;;  %2420 = vmatprep.mubr.bf16.mxu0 %v3867_v33  ;;  %v1835_v37 = vadd.f32 %v3484_v48, %v1770_v9 }
 0x156   :  { %v1949_v61 = vadd.f32 %v3552_v32, %v1884_v29  ;;  %v3515_v0 = vadd.f32 %v3514_v4, %v3513_v43  ;;  %v3554_v21 = vpop.f32.mrf.mxu1  ;;  %2390 = vmatprep.subr.bf16.mxu0 %v3800_v39  ;;  %v3821_v39 = vld [vmem:[%s4926_s3 + $0x124] ss:$8 sps:$4 sm:$0xff]   ;;  %v3819_v32 = vld [vmem:[%s4926_s3 + $0x120] ss:$8 sps:$4 sm:$0xff]   ;;  %v3827_v4 = vld [vmem:[%s4926_s3 + $0x114] ss:$8 sps:$4 sm:$0xff]  }
 0x157   :  { %v3516_v13 = vpop.f32.mrf.mxu0  ;;  %v3555_v15 = vadd.f32 %v3554_v21, %v3553_v50  ;;  %v3824_v43 = vld [vmem:[%s4926_s3 + $0x1c4] ss:$8 sps:$4 sm:$0xff]   ;;  %v3822_v50 = vld [vmem:[%s4926_s3 + $0x1c0] ss:$8 sps:$4 sm:$0xff]  }
 0x158   :  { %v1971_v34 = vmax.f32 %v1949_v61, 0.0  ;;  %v1889_v49 = vadd.f32 %v3515_v0, %v1824_v17  ;;  %v3556_v45 = vpop.f32.mrf.mxu1  ;;  %v3825_v61 = vld [vmem:[%s4926_s3 + $0x110] ss:$8 sps:$4 sm:$0xff]  }
 0x159   :  { %2391 = vmatpush1.bf16.msra.mxu0 %v3798_v52  ;;  %v3517_v10 = vpop.f32.mrf.mxu0  ;;  %v3830_v52 = vld [vmem:[%s4926_s3 + $0x1b4] ss:$8 sps:$4 sm:$0xff]   ;;  %v3828_v0 = vld [vmem:[%s4926_s3 + $0x1b0] ss:$8 sps:$4 sm:$0xff]  }
 0x15a   :  { %v1977_v6 = vpack.c.bf16 %v1971_v34, %v1970_v40  ;;  %v3518_v22 = vadd.f32 %v3517_v10, %v3516_v13  ;;  %v3557_v38 = vpop.f32.mrf.mxu1  ;;  %2392 = vmatprep.subr.bf16.mxu0 %v3803_v28  ;;  %v1954_v24 = vadd.f32 %v3555_v15, %v1889_v49  ;;  %v3833_v28 = vld [vmem:[%s4926_s3 + $0x104] ss:$8 sps:$4 sm:$0xff]   ;;  %v3831_v13 = vld [vmem:[%s4926_s3 + $0x100] ss:$8 sps:$4 sm:$0xff]   ;;  %v3839_v34 = vld [vmem:[%s4926_s3 + $0x194] ss:$8 sps:$4 sm:$0xff]  }
 0x15b   :  { %v3519_v41 = vpop.f32.mrf.mxu0  ;;  %v3558_v23 = vadd.f32 %v3557_v38, %v3556_v45  ;;  %v3834_v40 = vld [vmem:[%s4926_s3 + $0x1a0] ss:$8 sps:$4 sm:$0xff]   ;;  %v3837_v49 = vld [vmem:[%s4926_s3 + $0x190] ss:$8 sps:$4 sm:$0xff]   ;;  %v3842_v15 = vld [vmem:[%s4926_s3 + $0x184] ss:$8 sps:$4 sm:$0xff]  }
 0x15c   :  { %v1892_v51 = vadd.f32 %v3518_v22, %v1827_v5  ;;  %2269 = vmatmul.mubr.bf16.vlgmr.msra.gmra.mxu1 %v1977_v6  ;;  %v3559_v18 = vpop.f32.mrf.mxu1  ;;  %v1972_v26 = vmax.f32 %v1954_v24, 0.0  ;;  %v3840_v45 = vld [vmem:[%s4926_s3 + $0x180] ss:$8 sps:$4 sm:$0xff]   ;;  %v3844_v10 = vld [vmem:[%s4928_s5 + $0x38] sm:$0xff]  }
 0x15d   :  { %2393 = vmatpush1.bf16.msra.mxu0 %v3801_v55  ;;  %2541 = vmatpush1.bf16.msra.mxu1 %v3804_v44  ;;  %v3520_v54 = vpop.f32.mrf.mxu0  ;;  %v3845_v55 = vld [vmem:[%s4928_s5 + $0x70] sm:$0xff]   ;;  %v3847_v5 = vld [vmem:[%s4928_s5 + $0x68] sm:$0xff]   ;;  %v3849_v6 = vld [vmem:[%s4928_s5 + $0x60] sm:$0xff]  }
 0x15e   :  { %v1957_v14 = vadd.f32 %v3558_v23, %v1892_v51  ;;  %v3521_v25 = vadd.f32 %v3520_v54, %v3519_v41  ;;  %v3560_v53 = vpop.f32.mrf.mxu1  ;;  %2394 = vmatprep.subr.bf16.mxu0 %v3809_v19  ;;  %2542 = vmatprep.subr.bf16.mxu1 %v3812_v31  ;;  %v3846_v44 = vld [vmem:[%s4928_s5 + $0x30] sm:$0xff]   ;;  %v3850_v22 = vld [vmem:[%s4928_s5 + $0x20] sm:$0xff]   ;;  %v3851_v38 = vld [vmem:[%s4928_s5 + $0x58] sm:$0xff]  }
 0x15f   :  { %v3522_v30 = vpop.f32.mrf.mxu0  ;;  %2572 = vmatprep.mubr.bf16.mxu1 %v3867_v33  ;;  %v3561_v60 = vadd.f32 %v3560_v53, %v3559_v18  ;;  %v3852_v19 = vld [vmem:[%s4928_s5 + $0x18] sm:$0xff]   ;;  %v3853_v31 = vld [vmem:[%s4928_s5 + $0x50] sm:$0xff]   ;;  %v3855_v41 = vld [vmem:[%s4928_s5 + $0x48] sm:$0xff]   ;;  %v3868_v18 = vmov 0.0  }
 0x160   :  { %v1973_v56 = vmax.f32 %v1957_v14, 0.0  ;;  %v1897_v7 = vadd.f32 %v3521_v25, %v1832_v20  ;;  %v3562_v63 = vpop.f32.mrf.mxu1  ;;  %v3856_v23 = vld [vmem:[%s4928_s5 + $0x8] sm:$0xff]   ;;  %v3857_v24 = vld [vmem:[%s4928_s5 + $0x40] sm:$0xff]   ;;  %v3859_v20 = vld [vmem:[%s4929_s7 + $0x38] sm:$0xff]  }
 0x161   :  { %2395 = vmatpush1.bf16.msra.mxu0 %v3807_v57  ;;  %2543 = vmatpush1.bf16.msra.mxu1 %v3810_v59  ;;  %v3523_v11 = vpop.f32.mrf.mxu0  ;;  %v3858_v51 = vld [vmem:[%s4928_s5] sm:$0xff]   ;;  %v3860_v54 = vld [vmem:[%s4929_s7 + $0x30] sm:$0xff]   ;;  %v3861_v57 = vld [vmem:[%s4929_s7 + $0x28] sm:$0xff]  }
 0x162   :  { %v1978_v42 = vpack.c.bf16 %v1973_v56, %v1972_v26  ;;  %v3524_v58 = vadd.f32 %v3523_v11, %v3522_v30  ;;  %v3563_v33 = vpop.f32.mrf.mxu1  ;;  %2396 = vmatprep.subr.bf16.mxu0 %v3815_v27  ;;  %2544 = vmatprep.subr.bf16.mxu1 %v3818_v47  ;;  %v1962_v46 = vadd.f32 %v3561_v60, %v1897_v7  ;;  %v3862_v59 = vld [vmem:[%s4929_s7 + $0x20] sm:$0xff]   ;;  %v2597_v30 = vlaneseq }
 0x163   :  { %v3564_v2 = vadd.f32 %v3563_v33, %v3562_v63 }
 0x164   :  { %v1900_v29 = vadd.f32 %v3524_v58, %v1835_v37  ;;  %v1974_v17 = vmax.f32 %v1962_v46, 0.0  ;;  %v2598_v7 = vshrl.u32 %v2597_v30, 7 }
 0x165   :  { %2397 = vmatpush1.bf16.msra.mxu0 %v3813_v12  ;;  %2545 = vmatpush1.bf16.msra.mxu1 %v3816_v16 }
 0x166   :  { %v1965_v1 = vadd.f32 %v3564_v2, %v1900_v29  ;;  %2398 = vmatprep.subr.bf16.mxu0 %v3821_v39  ;;  %2546 = vmatprep.subr.bf16.mxu1 %v3824_v43  ;;  %v2603_v12 = vsub.s32 1, %v2598_v7  ;;  %v2595_v39 = vld [vmem:[%s4930_s4] sm:$0x3] }
 0x168   :  { %v1975_v62 = vmax.f32 %v1965_v1, 0.0  ;;  %v2604_v1 = vrot.slane %v2595_v39, %v2603_v12 }
 0x169   :  { %2399 = vmatpush1.bf16.msra.mxu0 %v3819_v32  ;;  %2547 = vmatpush1.bf16.msra.mxu1 %v3822_v50 }
 0x16a   :  { %v1979_v21 = vpack.c.bf16 %v1975_v62, %v1974_v17  ;;  %2400 = vmatprep.subr.bf16.mxu0 %v3827_v4  ;;  %2548 = vmatprep.subr.bf16.mxu1 %v3830_v52 }
 0x16d   :  { %2401 = vmatpush1.bf16.msra.mxu0 %v3825_v61  ;;  %2549 = vmatpush1.bf16.msra.mxu1 %v3828_v0 }
 0x16e   :  { %2402 = vmatprep.subr.bf16.mxu0 %v3833_v28  ;;  %2550 = vmatprep.subr.bf16.mxu1 %v3836_v8 }
 0x171   :  { %2403 = vmatpush1.bf16.msra.mxu0 %v3831_v13  ;;  %2551 = vmatpush1.bf16.msra.mxu1 %v3834_v40 }
 0x172   :  { %2552 = vmatprep.subr.bf16.mxu1 %v3839_v34  ;;  %3565 = vmatprep.subr.bf16.mxu0 %v3843_v36 }
 0x174   :  { %2421 = vmatmul.mubr.bf16.vlgmr.msra.gmra.mxu0 %v1978_v42  ;;  %v2599_v42 = vsub.s32 0, %v2598_v7 }
 0x175   :  { %2553 = vmatpush1.bf16.msra.mxu1 %v3837_v49  ;;  %3566 = vmatpush3.bf16.msra.mxu0 %v3844_v10 }
 0x176   :  { %2554 = vmatprep.subr.bf16.mxu1 %v3842_v15  ;;  %3567 = vmatprep.subr.bf16.mxu0 %v3845_v55  ;;  %v2600_v52 = vrot.slane %v2595_v39, %v2599_v42  ;;  %v3863_v55 = vld [vmem:[%s4929_s7 + $0x18] sm:$0xff]  }
 0x179   :  { %2555 = vmatpush1.bf16.msra.mxu1 %v3840_v45  ;;  %3568 = vmatpush3.bf16.msra.mxu0 %v3846_v44  ;;  %v3864_v44 = vld [vmem:[%s4929_s7 + $0x10] sm:$0xff]  }
 0x17a   :  { %3569 = vmatprep.subr.bf16.mxu0 %v3847_v5  ;;  %3596 = vmatprep.subr.bf16.mxu1 %v3868_v18  ;;  %v3865_v5 = vld [vmem:[%s4929_s7 + $0x8] sm:$0xff]  }
 0x17c   :  { %2573 = vmatmul.mubr.bf16.vlgmr.msra.gmra.mxu1 %v1979_v21 }
 0x17d   :  { %3570 = vmatpush3.bf16.msra.mxu0 %v3848_v3  ;;  %3597 = vmatpush3.bf16.msra.mxu1 %v3859_v20  ;;  %v3866_v3 = vld [vmem:[%s4929_s7] sm:$0xff]  }
 0x17e   :  { %3571 = vmatprep.subr.bf16.mxu0 %v3849_v6  ;;  %3598 = vmatprep.subr.bf16.mxu1 %v3868_v18 }
 0x17f   :  { %3612 = vmatprep.mubr.msk.bf16.mxu1 %vm3869_vm0, %v3868_v18 }
 0x181   :  { %3572 = vmatpush3.bf16.msra.mxu0 %v3850_v22  ;;  %3599 = vmatpush3.bf16.msra.mxu1 %v3860_v54 }
 0x182   :  { %3573 = vmatprep.subr.bf16.mxu0 %v3851_v38  ;;  %3600 = vmatprep.subr.bf16.mxu1 %v3868_v18 }
 0x185   :  { %3574 = vmatpush3.bf16.msra.mxu0 %v3852_v19  ;;  %3601 = vmatpush3.bf16.msra.mxu1 %v3861_v57  ;;  %v3219_v19 = vld [vmem:[%s4931_s6] ss:$0 sm:$0xff] }
 0x186   :  { %3575 = vmatprep.subr.bf16.mxu0 %v3853_v31  ;;  %3602 = vmatprep.subr.bf16.mxu1 %v3868_v18 }
 0x189   :  { %3576 = vmatpush3.bf16.msra.mxu0 %v3854_v35  ;;  %3603 = vmatpush3.bf16.msra.mxu1 %v3862_v59 }
 0x18a   :  { %3577 = vmatprep.subr.bf16.mxu0 %v3855_v41  ;;  %3604 = vmatprep.subr.bf16.mxu1 %v3868_v18 }
 0x18d   :  { %3578 = vmatpush3.bf16.msra.mxu0 %v3856_v23  ;;  %3605 = vmatpush3.bf16.msra.mxu1 %v3863_v55 }
 0x18e   :  { %3579 = vmatprep.subr.bf16.mxu0 %v3857_v24  ;;  %3606 = vmatprep.subr.bf16.mxu1 %v3868_v18 }
 0x191   :  { %3580 = vmatpush3.bf16.msra.mxu0 %v3858_v51  ;;  %3607 = vmatpush3.bf16.msra.mxu1 %v3864_v44 }
 0x192   :  { %3608 = vmatprep.subr.bf16.mxu1 %v3868_v18 }
 0x195   :  { %3609 = vmatpush3.bf16.msra.mxu1 %v3865_v5 }
 0x196   :  { %3610 = vmatprep.subr.bf16.mxu1 %v3868_v18  ;;  %v3236_v18 = vld [vmem:[%s4932_s8] ss:$0 sm:$0xff] }
 0x199   :  { %3611 = vmatpush3.bf16.msra.mxu1 %v3866_v3 }
 0x214   :  { %v2118_v9 = vpop.f32.mrf.mxu0 }
 0x216   :  { %v2120_v14 = vpop.f32.mrf.mxu0 }
 0x218   :  { %v2122_v25 = vpop.f32.mrf.mxu0 }
 0x21a   :  { %v2124_v27 = vpop.f32.mrf.mxu0 }
 0x21c   :  { %v2270_v53 = vpop.f32.mrf.mxu1 }
 0x21d   :  { %v2279_v16 = vadd.f32 %v2270_v53, %v2118_v9 }
 0x21e   :  { %v2272_v47 = vpop.f32.mrf.mxu1 }
 0x21f   :  { %v2280_v11 = vadd.f32 %v2272_v47, %v2120_v14 }
 0x220   :  { %v2274_v26 = vpop.f32.mrf.mxu1 }
 0x221   :  { %v2281_v58 = vadd.f32 %v2274_v26, %v2122_v25 }
 0x222   :  { %v2276_v60 = vpop.f32.mrf.mxu1 }
 0x223   :  { %v2282_v29 = vadd.f32 %v2276_v60, %v2124_v27 }
 0x234   :  { %v2422_v48 = vpop.f32.mrf.mxu0 }
 0x235   :  { %v2431_v43 = vadd.f32 %v2422_v48, %v2279_v16 }
 0x236   :  { %v2424_v56 = vpop.f32.mrf.mxu0 }
 0x237   :  { %v2432_v33 = vadd.f32 %v2424_v56, %v2280_v11 }
 0x238   :  { %v2426_v63 = vpop.f32.mrf.mxu0 }
 0x239   :  { %v2433_v32 = vadd.f32 %v2426_v63, %v2281_v58 }
 0x23a   :  { %v2428_v2 = vpop.f32.mrf.mxu0 }
 0x23b   :  { %v2434_v62 = vadd.f32 %v2428_v2, %v2282_v29 }
 0x23c   :  { %v2574_v37 = vpop.f32.mrf.mxu1 }
 0x23d   :  { %v2583_v4 = vadd.f32 %v2574_v37, %v2431_v43 }
 0x23e   :  { %v2576_v46 = vpop.f32.mrf.mxu1 }
 0x23f   :  { %v2584_v50 = vadd.f32 %v2576_v46, %v2432_v33  ;;  %v2607_v13 = vadd.f32 %v2600_v52, %v2583_v4 }
 0x240   :  { %v2578_v17 = vpop.f32.mrf.mxu1 }
 0x241   :  { %v2585_v61 = vadd.f32 %v2578_v17, %v2433_v32  ;;  %v2608_v21 = vadd.f32 %v2604_v1, %v2584_v50  ;;  %v2611_v45 = vmax.f32 %v2607_v13, 0.0 }
 0x242   :  { %v2580_v0 = vpop.f32.mrf.mxu1 }
 0x243   :  { %v2609_v28 = vadd.f32 %v2600_v52, %v2585_v61  ;;  %v2586_v8 = vadd.f32 %v2580_v0, %v2434_v62  ;;  %v2612_v49 = vmax.f32 %v2608_v21, 0.0 }
 0x245   :  { %v2610_v40 = vadd.f32 %v2604_v1, %v2586_v8  ;;  %v2613_v34 = vmax.f32 %v2609_v28, 0.0 }
 0x247   :  { %v2614_v15 = vmax.f32 %v2610_v40, 0.0  ;;  %v2615_v10 = vpack.c.bf16 %v2613_v34, %v2611_v45 }
 0x249   :  { %v2616_v36 = vpack.c.bf16 %v2614_v15, %v2612_v49 }
 0x24b   :  { %2784 = vmatprep.mubr.bf16.mxu0 %v2616_v36 }
 0x24c   :  { %2785 = vmatmul.mubr.bf16.vlgmr.msra.gmra.mxu0 %v2615_v10 }
 0x30c   :  { %v3581_v6 = vpop.f32.mrf.mxu0 }
 0x30e   :  { %v3582_v22 = vpop.f32.mrf.mxu0 }
 0x30f   :  { %v3583_v38 = vadd.f32 %v3582_v22, %v3581_v6 }
 0x310   :  { %v3584_v31 = vpop.f32.mrf.mxu0 }
 0x311   :  { %v2787_v41 = vadd.f32 %v3583_v38, %v3219_v19 }
 0x312   :  { %v3585_v35 = vpop.f32.mrf.mxu0 }
 0x313   :  { %v3586_v23 = vadd.f32 %v3585_v35, %v3584_v31  ;;  %v2793_v51 = vmax.f32 %v2787_v41, 0.0 }
 0x315   :  { %v2790_v24 = vadd.f32 %v3586_v23, %v3219_v19 }
 0x317   :  { %v2794_v20 = vmax.f32 %v2790_v24, 0.0 }
 0x319   :  { %v2795_v54 = vpack.c.bf16 %v2794_v20, %v2793_v51 }
 0x31b   :  { %3613 = vmatmul.mubr.bf16.vlgmr.msra.gmra.mxu1 %v2795_v54 }
 0x3db   :  { %v2901_v57 = vpop.f32.mrf.mxu1 }
 0x3dc   :  { %v2902_v59 = vadd.f32 %v3236_v18, %v2901_v57 }
 0x3dd   :  { %v3614_v9 = vpop.f32.mrf.mxu1 }
 0x3de   :  { %2908 = vst [vmem:[%s4933_s9] sm:$0xff] %v2902_v59 }
 0x3df   :  { %v2904_v14 = vpop.f32.mrf.mxu1 }
 0x3e0   :  { %v2905_v25 = vadd.f32 %v3236_v18, %v2904_v14 }
 0x3e1   :  { %v3615_v53 = vpop.f32.mrf.mxu1 }
 0x3e2   :  { %2909 = vst [vmem:[%s4933_s9 + $0x8] sm:$0xff] %v2905_v25 }

</bundles_post_ra>
